<compile_context>
chip_gen: v6e
topology: v6e:2x2x1
jax: 0.10.0
libtpu: 0.0.40
codegen_flags: <defaults>
</compile_context>

<pallas_src>
import functools

import jax
import jax.numpy as jnp
from jax.experimental import pallas as pl
from jax.experimental.pallas import tpu as pltpu

TEMPERATURE = 0.07
BASE_TEMPERATURE = 0.07


def _vmem_spec():
    return pl.BlockSpec(memory_space=pltpu.MemorySpace.VMEM)


# ---------------------------------------------------------------------------
# Single fused kernel: encoders + normalize + SupCon + ortho + weighted sum
# ---------------------------------------------------------------------------
def _focal_kernel(
    x1_ref, x2_ref, v1_ref, v2_ref,
    # encoder_x1s
    w1a_ref, b1a_ref, w2a_ref, b2a_ref,
    # encoder_x2s
    w1b_ref, b1b_ref, w2b_ref, b2b_ref,
    # encoder_x1 (first layer pre-split into x-part / e_c-part)
    w1cx_ref, w1ce_ref, b1c_ref, w2c_ref, b2c_ref,
    # encoder_x2 (first layer pre-split)
    w1dx_ref, w1de_ref, b1d_ref, w2d_ref, b2d_ref,
    out_ref,
    *, a, lmd,
):
    B = x1_ref.shape[0]

    # Stack the two views on the row axis so each encoder runs once (2B rows).
    xv1 = jnp.concatenate([x1_ref[...], v1_ref[...]], axis=0)   # (2B, X1D)
    xv2 = jnp.concatenate([x2_ref[...], v2_ref[...]], axis=0)   # (2B, X2D)

    def mlp2(x, w1, b1, w2, b2):
        h = jnp.maximum(jnp.dot(x, w1, preferred_element_type=jnp.float32) + b1, 0.0)
        return jnp.dot(h, w2, preferred_element_type=jnp.float32) + b2

    # Shared ("common") embeddings, unnormalized (they feed the specific MLPs).
    e1c = mlp2(xv1, w1a_ref[...], b1a_ref[...], w2a_ref[...], b2a_ref[...])   # (2B, E)
    e2c = mlp2(xv2, w1b_ref[...], b1b_ref[...], w2b_ref[...], b2b_ref[...])   # (2B, E)

    # Specific embeddings: split first layer replaces cat([x, e_c], dim=1).
    h1 = jnp.maximum(
        jnp.dot(xv1, w1cx_ref[...], preferred_element_type=jnp.float32)
        + jnp.dot(e1c, w1ce_ref[...], preferred_element_type=jnp.float32)
        + b1c_ref[...], 0.0)
    e1s = jnp.dot(h1, w2c_ref[...], preferred_element_type=jnp.float32) + b2c_ref[...]
    h2 = jnp.maximum(
        jnp.dot(xv2, w1dx_ref[...], preferred_element_type=jnp.float32)
        + jnp.dot(e2c, w1de_ref[...], preferred_element_type=jnp.float32)
        + b1d_ref[...], 0.0)
    e2s = jnp.dot(h2, w2d_ref[...], preferred_element_type=jnp.float32) + b2d_ref[...]

    # Row-wise L2 normalization (F.normalize semantics, eps=1e-12).
    def l2n(x):
        n = jnp.sqrt(jnp.sum(x * x, axis=-1, keepdims=True))
        return x / jnp.maximum(n, 1e-12)

    n1c, n2c, n1s, n2s = l2n(e1c), l2n(e2c), l2n(e1s), l2n(e2s)

    def supcon_pair(f1, f2):
        # Standard SupCon over two views, no labels: each anchor's single
        # positive is its partner view -> no mask materialization needed.
        feats = jnp.concatenate([f1, f2], axis=0)                       # (2B, D)
        n = feats.shape[0]
        sim = jax.lax.dot_general(
            feats, feats, (((1,), (1,)), ((), ())),
            preferred_element_type=jnp.float32) / TEMPERATURE           # (2B, 2B)
        logits_max = jnp.max(sim, axis=1, keepdims=True)                # (2B, 1)
        logits = sim - logits_max
        row = jax.lax.broadcasted_iota(jnp.int32, (n, n), 0)
        col = jax.lax.broadcasted_iota(jnp.int32, (n, n), 1)
        exp_logits = jnp.where(row == col, 0.0, jnp.exp(logits))        # drop self
        denom = jnp.sum(exp_logits, axis=1, keepdims=True)              # (2B, 1)
        pos = jnp.sum(f1 * f2, axis=-1, keepdims=True) / TEMPERATURE    # (B, 1)
        pos = jnp.concatenate([pos, pos], axis=0)                       # (2B, 1)
        log_prob_pos = (pos - logits_max) - jnp.log(denom)              # (2B, 1)
        return -(TEMPERATURE / BASE_TEMPERATURE) * jnp.sum(
            log_prob_pos, axis=0, keepdims=True) / n                    # (1, 1)

    # joint: pairs (e1_c, e2_c) and (e1_c_v, e2_c_v)
    joint = supcon_pair(n1c[:B], n2c[:B]) + supcon_pair(n1c[B:], n2c[B:])
    # specific: pairs (e1_s, e1_s_v) and (e2_s, e2_s_v)
    specific = supcon_pair(n1s[:B], n1s[B:]) + supcon_pair(n2s[:B], n2s[B:])

    def ortho_sum(p, q):
        # sum over all 2B rows of |<p_i, q_i>|
        return jnp.sum(jnp.abs(jnp.sum(p * q, axis=-1, keepdims=True)),
                       axis=0, keepdims=True)                           # (1, 1)

    # ortho(e1_s,e1_c)+ortho(e1_s_v,e1_c_v) == sum over 2B rows / B, etc. ->
    # the six mean-over-B terms collapse to three sums over the stacked rows.
    ortho = (ortho_sum(n1s, n1c) + ortho_sum(n2s, n2c)
             + ortho_sum(n1s, n2s)) / B

    total = joint + a * specific + lmd * ortho                          # (1, 1)

    # Pack [total, joint, specific, ortho] into the (1, 4) output in one store.
    idx = jax.lax.broadcasted_iota(jnp.int32, (1, 4), 1)
    out_ref[...] = (jnp.where(idx == 0, total, 0.0)
                    + jnp.where(idx == 1, joint, 0.0)
                    + jnp.where(idx == 2, specific, 0.0)
                    + jnp.where(idx == 3, ortho, 0.0))


# ---------------------------------------------------------------------------
# Parameter init (Xavier-uniform, zero bias)
# ---------------------------------------------------------------------------
def _xavier(key, fan_in, fan_out):
    limit = (6.0 / (fan_in + fan_out)) ** 0.5
    return jax.random.uniform(
        key, (fan_in, fan_out), jnp.float32, minval=-limit, maxval=limit)


def _init_mlp(key, in_dim, hidden_dim, out_dim):
    k1, k2 = jax.random.split(key)
    return (_xavier(k1, in_dim, hidden_dim),
            jnp.zeros((1, hidden_dim), jnp.float32),
            _xavier(k2, hidden_dim, out_dim),
            jnp.zeros((1, out_dim), jnp.float32))


def _init_mlp_split(key, x_dim, e_dim, hidden_dim, out_dim):
    # Same init as a single (x_dim+e_dim, hidden) layer, stored pre-split so
    # the kernel never needs the concatenated [x, e_c] activation.
    w1, b1, w2, b2 = _init_mlp(key, x_dim + e_dim, hidden_dim, out_dim)
    return (w1[:x_dim], w1[x_dim:], b1, w2, b2)


def init_focal_params(key, x1_dim, x2_dim, hidden_dim, embed_dim):
    k1, k2, k3, k4 = jax.random.split(key, 4)
    return {
        "encoder_x1s": _init_mlp(k1, x1_dim, hidden_dim, embed_dim),
        "encoder_x2s": _init_mlp(k2, x2_dim, hidden_dim, embed_dim),
        "encoder_x1": _init_mlp_split(k3, x1_dim, embed_dim, hidden_dim, embed_dim),
        "encoder_x2": _init_mlp_split(k4, x2_dim, embed_dim, hidden_dim, embed_dim),
    }


# ---------------------------------------------------------------------------
# Focal forward pass: one pallas_call, one host transfer for the logs
# ---------------------------------------------------------------------------
def focal_forward(params, x1, x2, v1, v2, a=1.0, lmd=0.001):
    kernel = functools.partial(_focal_kernel, a=float(a), lmd=float(lmd))
    losses = pl.pallas_call(
        kernel,
        out_shape=jax.ShapeDtypeStruct((1, 4), jnp.float32),
        in_specs=[_vmem_spec()] * 22,
        out_specs=_vmem_spec(),
    )(x1, x2, v1, v2,
      *params["encoder_x1s"], *params["encoder_x2s"],
      *params["encoder_x1"], *params["encoder_x2"])

    loss = losses[0, 0]                      # jnp scalar (stays on device)
    vals = jax.device_get(losses)[0]         # single host sync for the logs
    logs = {
        "loss": float(vals[0]),
        "loss_shared": float(vals[1]),
        "loss_specific": float(vals[2]),
        "loss_ortho": float(vals[3]),
    }
    return loss, logs


if __name__ == "__main__":
    # Small shapes consistent with the module: batch=8, x1_dim=16, x2_dim=12,
    # hidden_dim=32, embed_dim=16, layers=2.
    B, X1D, X2D, HID, EMB = 8, 16, 12, 32, 16

    root = jax.random.PRNGKey(0)
    kp, kx1, kx2, kv1, kv2 = jax.random.split(root, 5)

    params = init_focal_params(kp, X1D, X2D, HID, EMB)
    x1 = jax.random.normal(kx1, (B, X1D), jnp.float32)
    x2 = jax.random.normal(kx2, (B, X2D), jnp.float32)
    v1 = jax.random.normal(kv1, (B, X1D), jnp.float32)
    v2 = jax.random.normal(kv2, (B, X2D), jnp.float32)

    loss, logs = focal_forward(params, x1, x2, v1, v2, a=1.0, lmd=0.001)
    jax.block_until_ready(loss)
    assert jnp.isfinite(loss), "non-finite loss"
    print("KERNEL_OK")
</pallas_src>

<mosaic_0001>
module attributes {stable_mosaic.version = 11 : i64} {
  func.func @_focal_kernel(%arg0: memref<8x16xf32, #tpu.memory_space<vmem>>, %arg1: memref<8x12xf32, #tpu.memory_space<vmem>>, %arg2: memref<8x16xf32, #tpu.memory_space<vmem>>, %arg3: memref<8x12xf32, #tpu.memory_space<vmem>>, %arg4: memref<16x32xf32, #tpu.memory_space<vmem>>, %arg5: memref<1x32xf32, #tpu.memory_space<vmem>>, %arg6: memref<32x16xf32, #tpu.memory_space<vmem>>, %arg7: memref<1x16xf32, #tpu.memory_space<vmem>>, %arg8: memref<12x32xf32, #tpu.memory_space<vmem>>, %arg9: memref<1x32xf32, #tpu.memory_space<vmem>>, %arg10: memref<32x16xf32, #tpu.memory_space<vmem>>, %arg11: memref<1x16xf32, #tpu.memory_space<vmem>>, %arg12: memref<16x32xf32, #tpu.memory_space<vmem>>, %arg13: memref<16x32xf32, #tpu.memory_space<vmem>>, %arg14: memref<1x32xf32, #tpu.memory_space<vmem>>, %arg15: memref<32x16xf32, #tpu.memory_space<vmem>>, %arg16: memref<1x16xf32, #tpu.memory_space<vmem>>, %arg17: memref<12x32xf32, #tpu.memory_space<vmem>>, %arg18: memref<16x32xf32, #tpu.memory_space<vmem>>, %arg19: memref<1x32xf32, #tpu.memory_space<vmem>>, %arg20: memref<32x16xf32, #tpu.memory_space<vmem>>, %arg21: memref<1x16xf32, #tpu.memory_space<vmem>>, %arg22: memref<1x4xf32, #tpu.memory_space<vmem>>) attributes {dimension_semantics = [], scalar_prefetch = 0 : i64, scratch_operands = 0 : i64, tpu.core_type = #tpu.core_type<tc>} {
    %c0 = arith.constant 0 : index
    %c0_0 = arith.constant 0 : index
    %0 = vector.load %arg0[%c0, %c0_0] : memref<8x16xf32, #tpu.memory_space<vmem>>, vector<8x16xf32>
    %c0_1 = arith.constant 0 : index
    %c0_2 = arith.constant 0 : index
    %1 = vector.load %arg2[%c0_1, %c0_2] : memref<8x16xf32, #tpu.memory_space<vmem>>, vector<8x16xf32>
    %2 = tpu.concatenate %0, %1 in 0 : vector<8x16xf32>, vector<8x16xf32> -> vector<16x16xf32>
    %c0_3 = arith.constant 0 : index
    %c0_4 = arith.constant 0 : index
    %3 = vector.load %arg1[%c0_3, %c0_4] : memref<8x12xf32, #tpu.memory_space<vmem>>, vector<8x12xf32>
    %c0_5 = arith.constant 0 : index
    %c0_6 = arith.constant 0 : index
    %4 = vector.load %arg3[%c0_5, %c0_6] : memref<8x12xf32, #tpu.memory_space<vmem>>, vector<8x12xf32>
    %5 = tpu.concatenate %3, %4 in 0 : vector<8x12xf32>, vector<8x12xf32> -> vector<16x12xf32>
    %c0_7 = arith.constant 0 : index
    %c0_8 = arith.constant 0 : index
    %6 = vector.load %arg4[%c0_7, %c0_8] : memref<16x32xf32, #tpu.memory_space<vmem>>, vector<16x32xf32>
    %c0_9 = arith.constant 0 : index
    %c0_10 = arith.constant 0 : index
    %7 = vector.load %arg5[%c0_9, %c0_10] : memref<1x32xf32, #tpu.memory_space<vmem>>, vector<1x32xf32>
    %c0_11 = arith.constant 0 : index
    %c0_12 = arith.constant 0 : index
    %8 = vector.load %arg6[%c0_11, %c0_12] : memref<32x16xf32, #tpu.memory_space<vmem>>, vector<32x16xf32>
    %c0_13 = arith.constant 0 : index
    %c0_14 = arith.constant 0 : index
    %9 = vector.load %arg7[%c0_13, %c0_14] : memref<1x16xf32, #tpu.memory_space<vmem>>, vector<1x16xf32>
    %cst = arith.constant dense<0.000000e+00> : vector<16x32xf32>
    %10 = tpu.matmul %2, %6, %cst {dimension_numbers = #tpu.dot_dimension_numbers<[1], [0], [0], [1], [0, 0, 1, 1], [], []>} : vector<16x16xf32>, vector<16x32xf32>, vector<16x32xf32> -> vector<16x32xf32>
    %11 = vector.broadcast %7 : vector<1x32xf32> to vector<16x32xf32>
    %12 = arith.addf %10, %11 : vector<16x32xf32>
    %cst_15 = arith.constant 0.000000e+00 : f32
    %13 = vector.broadcast %cst_15 : f32 to vector<16x32xf32>
    %14 = arith.maximumf %12, %13 : vector<16x32xf32>
    %cst_16 = arith.constant dense<0.000000e+00> : vector<16x16xf32>
    %15 = tpu.matmul %14, %8, %cst_16 {dimension_numbers = #tpu.dot_dimension_numbers<[1], [0], [0], [1], [0, 0, 1, 1], [], []>} : vector<16x32xf32>, vector<32x16xf32>, vector<16x16xf32> -> vector<16x16xf32>
    %16 = vector.broadcast %9 : vector<1x16xf32> to vector<16x16xf32>
    %17 = arith.addf %15, %16 : vector<16x16xf32>
    %c0_17 = arith.constant 0 : index
    %c0_18 = arith.constant 0 : index
    %18 = vector.load %arg8[%c0_17, %c0_18] : memref<12x32xf32, #tpu.memory_space<vmem>>, vector<12x32xf32>
    %c0_19 = arith.constant 0 : index
    %c0_20 = arith.constant 0 : index
    %19 = vector.load %arg9[%c0_19, %c0_20] : memref<1x32xf32, #tpu.memory_space<vmem>>, vector<1x32xf32>
    %c0_21 = arith.constant 0 : index
    %c0_22 = arith.constant 0 : index
    %20 = vector.load %arg10[%c0_21, %c0_22] : memref<32x16xf32, #tpu.memory_space<vmem>>, vector<32x16xf32>
    %c0_23 = arith.constant 0 : index
    %c0_24 = arith.constant 0 : index
    %21 = vector.load %arg11[%c0_23, %c0_24] : memref<1x16xf32, #tpu.memory_space<vmem>>, vector<1x16xf32>
    %cst_25 = arith.constant dense<0.000000e+00> : vector<16x32xf32>
    %22 = tpu.matmul %5, %18, %cst_25 {dimension_numbers = #tpu.dot_dimension_numbers<[1], [0], [0], [1], [0, 0, 1, 1], [], []>} : vector<16x12xf32>, vector<12x32xf32>, vector<16x32xf32> -> vector<16x32xf32>
    %23 = vector.broadcast %19 : vector<1x32xf32> to vector<16x32xf32>
    %24 = arith.addf %22, %23 : vector<16x32xf32>
    %cst_26 = arith.constant 0.000000e+00 : f32
    %25 = vector.broadcast %cst_26 : f32 to vector<16x32xf32>
    %26 = arith.maximumf %24, %25 : vector<16x32xf32>
    %cst_27 = arith.constant dense<0.000000e+00> : vector<16x16xf32>
    %27 = tpu.matmul %26, %20, %cst_27 {dimension_numbers = #tpu.dot_dimension_numbers<[1], [0], [0], [1], [0, 0, 1, 1], [], []>} : vector<16x32xf32>, vector<32x16xf32>, vector<16x16xf32> -> vector<16x16xf32>
    %28 = vector.broadcast %21 : vector<1x16xf32> to vector<16x16xf32>
    %29 = arith.addf %27, %28 : vector<16x16xf32>
    %c0_28 = arith.constant 0 : index
    %c0_29 = arith.constant 0 : index
    %30 = vector.load %arg12[%c0_28, %c0_29] : memref<16x32xf32, #tpu.memory_space<vmem>>, vector<16x32xf32>
    %cst_30 = arith.constant dense<0.000000e+00> : vector<16x32xf32>
    %31 = tpu.matmul %2, %30, %cst_30 {dimension_numbers = #tpu.dot_dimension_numbers<[1], [0], [0], [1], [0, 0, 1, 1], [], []>} : vector<16x16xf32>, vector<16x32xf32>, vector<16x32xf32> -> vector<16x32xf32>
    %c0_31 = arith.constant 0 : index
    %c0_32 = arith.constant 0 : index
    %32 = vector.load %arg13[%c0_31, %c0_32] : memref<16x32xf32, #tpu.memory_space<vmem>>, vector<16x32xf32>
    %cst_33 = arith.constant dense<0.000000e+00> : vector<16x32xf32>
    %33 = tpu.matmul %17, %32, %cst_33 {dimension_numbers = #tpu.dot_dimension_numbers<[1], [0], [0], [1], [0, 0, 1, 1], [], []>} : vector<16x16xf32>, vector<16x32xf32>, vector<16x32xf32> -> vector<16x32xf32>
    %34 = arith.addf %31, %33 : vector<16x32xf32>
    %c0_34 = arith.constant 0 : index
    %c0_35 = arith.constant 0 : index
    %35 = vector.load %arg14[%c0_34, %c0_35] : memref<1x32xf32, #tpu.memory_space<vmem>>, vector<1x32xf32>
    %36 = vector.broadcast %35 : vector<1x32xf32> to vector<16x32xf32>
    %37 = arith.addf %34, %36 : vector<16x32xf32>
    %cst_36 = arith.constant 0.000000e+00 : f32
    %38 = vector.broadcast %cst_36 : f32 to vector<16x32xf32>
    %39 = arith.maximumf %37, %38 : vector<16x32xf32>
    %c0_37 = arith.constant 0 : index
    %c0_38 = arith.constant 0 : index
    %40 = vector.load %arg15[%c0_37, %c0_38] : memref<32x16xf32, #tpu.memory_space<vmem>>, vector<32x16xf32>
    %cst_39 = arith.constant dense<0.000000e+00> : vector<16x16xf32>
    %41 = tpu.matmul %39, %40, %cst_39 {dimension_numbers = #tpu.dot_dimension_numbers<[1], [0], [0], [1], [0, 0, 1, 1], [], []>} : vector<16x32xf32>, vector<32x16xf32>, vector<16x16xf32> -> vector<16x16xf32>
    %c0_40 = arith.constant 0 : index
    %c0_41 = arith.constant 0 : index
    %42 = vector.load %arg16[%c0_40, %c0_41] : memref<1x16xf32, #tpu.memory_space<vmem>>, vector<1x16xf32>
    %43 = vector.broadcast %42 : vector<1x16xf32> to vector<16x16xf32>
    %44 = arith.addf %41, %43 : vector<16x16xf32>
    %c0_42 = arith.constant 0 : index
    %c0_43 = arith.constant 0 : index
    %45 = vector.load %arg17[%c0_42, %c0_43] : memref<12x32xf32, #tpu.memory_space<vmem>>, vector<12x32xf32>
    %cst_44 = arith.constant dense<0.000000e+00> : vector<16x32xf32>
    %46 = tpu.matmul %5, %45, %cst_44 {dimension_numbers = #tpu.dot_dimension_numbers<[1], [0], [0], [1], [0, 0, 1, 1], [], []>} : vector<16x12xf32>, vector<12x32xf32>, vector<16x32xf32> -> vector<16x32xf32>
    %c0_45 = arith.constant 0 : index
    %c0_46 = arith.constant 0 : index
    %47 = vector.load %arg18[%c0_45, %c0_46] : memref<16x32xf32, #tpu.memory_space<vmem>>, vector<16x32xf32>
    %cst_47 = arith.constant dense<0.000000e+00> : vector<16x32xf32>
    %48 = tpu.matmul %29, %47, %cst_47 {dimension_numbers = #tpu.dot_dimension_numbers<[1], [0], [0], [1], [0, 0, 1, 1], [], []>} : vector<16x16xf32>, vector<16x32xf32>, vector<16x32xf32> -> vector<16x32xf32>
    %49 = arith.addf %46, %48 : vector<16x32xf32>
    %c0_48 = arith.constant 0 : index
    %c0_49 = arith.constant 0 : index
    %50 = vector.load %arg19[%c0_48, %c0_49] : memref<1x32xf32, #tpu.memory_space<vmem>>, vector<1x32xf32>
    %51 = vector.broadcast %50 : vector<1x32xf32> to vector<16x32xf32>
    %52 = arith.addf %49, %51 : vector<16x32xf32>
    %cst_50 = arith.constant 0.000000e+00 : f32
    %53 = vector.broadcast %cst_50 : f32 to vector<16x32xf32>
    %54 = arith.maximumf %52, %53 : vector<16x32xf32>
    %c0_51 = arith.constant 0 : index
    %c0_52 = arith.constant 0 : index
    %55 = vector.load %arg20[%c0_51, %c0_52] : memref<32x16xf32, #tpu.memory_space<vmem>>, vector<32x16xf32>
    %cst_53 = arith.constant dense<0.000000e+00> : vector<16x16xf32>
    %56 = tpu.matmul %54, %55, %cst_53 {dimension_numbers = #tpu.dot_dimension_numbers<[1], [0], [0], [1], [0, 0, 1, 1], [], []>} : vector<16x32xf32>, vector<32x16xf32>, vector<16x16xf32> -> vector<16x16xf32>
    %c0_54 = arith.constant 0 : index
    %c0_55 = arith.constant 0 : index
    %57 = vector.load %arg21[%c0_54, %c0_55] : memref<1x16xf32, #tpu.memory_space<vmem>>, vector<1x16xf32>
    %58 = vector.broadcast %57 : vector<1x16xf32> to vector<16x16xf32>
    %59 = arith.addf %56, %58 : vector<16x16xf32>
    %60 = arith.mulf %17, %17 : vector<16x16xf32>
    %cst_56 = arith.constant dense<0.000000e+00> : vector<16xf32>
    %61 = vector.multi_reduction <add>, %60, %cst_56 [1] : vector<16x16xf32> to vector<16xf32>
    %62 = vector.shape_cast %61 : vector<16xf32> to vector<16x1xf32>
    %63 = math.sqrt %62 : vector<16x1xf32>
    %cst_57 = arith.constant 9.99999996E-13 : f32
    %64 = vector.broadcast %cst_57 : f32 to vector<16x1xf32>
    %65 = arith.maximumf %63, %64 : vector<16x1xf32>
    %66 = vector.broadcast %65 : vector<16x1xf32> to vector<16x16xf32>
    %67 = arith.divf %17, %66 : vector<16x16xf32>
    %68 = arith.mulf %29, %29 : vector<16x16xf32>
    %cst_58 = arith.constant dense<0.000000e+00> : vector<16xf32>
    %69 = vector.multi_reduction <add>, %68, %cst_58 [1] : vector<16x16xf32> to vector<16xf32>
    %70 = vector.shape_cast %69 : vector<16xf32> to vector<16x1xf32>
    %71 = math.sqrt %70 : vector<16x1xf32>
    %cst_59 = arith.constant 9.99999996E-13 : f32
    %72 = vector.broadcast %cst_59 : f32 to vector<16x1xf32>
    %73 = arith.maximumf %71, %72 : vector<16x1xf32>
    %74 = vector.broadcast %73 : vector<16x1xf32> to vector<16x16xf32>
    %75 = arith.divf %29, %74 : vector<16x16xf32>
    %76 = arith.mulf %44, %44 : vector<16x16xf32>
    %cst_60 = arith.constant dense<0.000000e+00> : vector<16xf32>
    %77 = vector.multi_reduction <add>, %76, %cst_60 [1] : vector<16x16xf32> to vector<16xf32>
    %78 = vector.shape_cast %77 : vector<16xf32> to vector<16x1xf32>
    %79 = math.sqrt %78 : vector<16x1xf32>
    %cst_61 = arith.constant 9.99999996E-13 : f32
    %80 = vector.broadcast %cst_61 : f32 to vector<16x1xf32>
    %81 = arith.maximumf %79, %80 : vector<16x1xf32>
    %82 = vector.broadcast %81 : vector<16x1xf32> to vector<16x16xf32>
    %83 = arith.divf %44, %82 : vector<16x16xf32>
    %84 = arith.mulf %59, %59 : vector<16x16xf32>
    %cst_62 = arith.constant dense<0.000000e+00> : vector<16xf32>
    %85 = vector.multi_reduction <add>, %84, %cst_62 [1] : vector<16x16xf32> to vector<16xf32>
    %86 = vector.shape_cast %85 : vector<16xf32> to vector<16x1xf32>
    %87 = math.sqrt %86 : vector<16x1xf32>
    %cst_63 = arith.constant 9.99999996E-13 : f32
    %88 = vector.broadcast %cst_63 : f32 to vector<16x1xf32>
    %89 = arith.maximumf %87, %88 : vector<16x1xf32>
    %90 = vector.broadcast %89 : vector<16x1xf32> to vector<16x16xf32>
    %91 = arith.divf %59, %90 : vector<16x16xf32>
    %92 = vector.extract_strided_slice %67 {offsets = [0, 0], sizes = [8, 16], strides = [1, 1]} : vector<16x16xf32> to vector<8x16xf32>
    %93 = vector.extract_strided_slice %75 {offsets = [0, 0], sizes = [8, 16], strides = [1, 1]} : vector<16x16xf32> to vector<8x16xf32>
    %94 = tpu.concatenate %92, %93 in 0 : vector<8x16xf32>, vector<8x16xf32> -> vector<16x16xf32>
    %cst_64 = arith.constant dense<0.000000e+00> : vector<16x16xf32>
    %95 = tpu.matmul %94, %94, %cst_64 {dimension_numbers = #tpu.dot_dimension_numbers<[1], [1], [0], [0], [0, 0, 1, 0], [], []>} : vector<16x16xf32>, vector<16x16xf32>, vector<16x16xf32> -> vector<16x16xf32>
    %cst_65 = arith.constant 7.000000e-02 : f32
    %96 = vector.broadcast %cst_65 : f32 to vector<16x16xf32>
    %97 = arith.divf %95, %96 : vector<16x16xf32>
    %cst_66 = arith.constant dense<0xFF800000> : vector<16xf32>
    %98 = vector.multi_reduction <maximumf>, %97, %cst_66 [1] : vector<16x16xf32> to vector<16xf32>
    %99 = vector.shape_cast %98 : vector<16xf32> to vector<16x1xf32>
    %100 = vector.broadcast %99 : vector<16x1xf32> to vector<16x16xf32>
    %101 = arith.subf %97, %100 : vector<16x16xf32>
    %102 = tpu.iota {dimensions = array<i32: 0>} : vector<16x16xi32>
    %103 = tpu.iota {dimensions = array<i32: 1>} : vector<16x16xi32>
    %104 = arith.cmpi eq, %102, %103 : vector<16x16xi32>
    %105 = math.exp %101 : vector<16x16xf32>
    %cst_67 = arith.constant 0.000000e+00 : f32
    %106 = vector.broadcast %cst_67 : f32 to vector<16x16xf32>
    %107 = arith.select %104, %106, %105 : vector<16x16xi1>, vector<16x16xf32>
    %cst_68 = arith.constant dense<0.000000e+00> : vector<16xf32>
    %108 = vector.multi_reduction <add>, %107, %cst_68 [1] : vector<16x16xf32> to vector<16xf32>
    %109 = vector.shape_cast %108 : vector<16xf32> to vector<16x1xf32>
    %110 = arith.mulf %92, %93 : vector<8x16xf32>
    %cst_69 = arith.constant dense<0.000000e+00> : vector<8xf32>
    %111 = vector.multi_reduction <add>, %110, %cst_69 [1] : vector<8x16xf32> to vector<8xf32>
    %112 = vector.shape_cast %111 : vector<8xf32> to vector<8x1xf32>
    %cst_70 = arith.constant 7.000000e-02 : f32
    %113 = vector.broadcast %cst_70 : f32 to vector<8x1xf32>
    %114 = arith.divf %112, %113 : vector<8x1xf32>
    %115 = tpu.concatenate %114, %114 in 0 : vector<8x1xf32>, vector<8x1xf32> -> vector<16x1xf32>
    %116 = arith.subf %115, %99 : vector<16x1xf32>
    %117 = math.log %109 : vector<16x1xf32>
    %118 = arith.subf %116, %117 : vector<16x1xf32>
    %cst_71 = arith.constant dense<0.000000e+00> : vector<1xf32>
    %119 = vector.multi_reduction <add>, %118, %cst_71 [0] : vector<16x1xf32> to vector<1xf32>
    %120 = vector.shape_cast %119 : vector<1xf32> to vector<1x1xf32>
    %cst_72 = arith.constant -1.000000e+00 : f32
    %121 = vector.broadcast %cst_72 : f32 to vector<1x1xf32>
    %122 = arith.mulf %121, %120 : vector<1x1xf32>
    %cst_73 = arith.constant 1.600000e+01 : f32
    %123 = vector.broadcast %cst_73 : f32 to vector<1x1xf32>
    %124 = arith.divf %122, %123 : vector<1x1xf32>
    %125 = vector.extract_strided_slice %67 {offsets = [8, 0], sizes = [8, 16], strides = [1, 1]} : vector<16x16xf32> to vector<8x16xf32>
    %126 = vector.extract_strided_slice %75 {offsets = [8, 0], sizes = [8, 16], strides = [1, 1]} : vector<16x16xf32> to vector<8x16xf32>
    %127 = tpu.concatenate %125, %126 in 0 : vector<8x16xf32>, vector<8x16xf32> -> vector<16x16xf32>
    %cst_74 = arith.constant dense<0.000000e+00> : vector<16x16xf32>
    %128 = tpu.matmul %127, %127, %cst_74 {dimension_numbers = #tpu.dot_dimension_numbers<[1], [1], [0], [0], [0, 0, 1, 0], [], []>} : vector<16x16xf32>, vector<16x16xf32>, vector<16x16xf32> -> vector<16x16xf32>
    %cst_75 = arith.constant 7.000000e-02 : f32
    %129 = vector.broadcast %cst_75 : f32 to vector<16x16xf32>
    %130 = arith.divf %128, %129 : vector<16x16xf32>
    %cst_76 = arith.constant dense<0xFF800000> : vector<16xf32>
    %131 = vector.multi_reduction <maximumf>, %130, %cst_76 [1] : vector<16x16xf32> to vector<16xf32>
    %132 = vector.shape_cast %131 : vector<16xf32> to vector<16x1xf32>
    %133 = vector.broadcast %132 : vector<16x1xf32> to vector<16x16xf32>
    %134 = arith.subf %130, %133 : vector<16x16xf32>
    %135 = tpu.iota {dimensions = array<i32: 0>} : vector<16x16xi32>
    %136 = tpu.iota {dimensions = array<i32: 1>} : vector<16x16xi32>
    %137 = arith.cmpi eq, %135, %136 : vector<16x16xi32>
    %138 = math.exp %134 : vector<16x16xf32>
    %cst_77 = arith.constant 0.000000e+00 : f32
    %139 = vector.broadcast %cst_77 : f32 to vector<16x16xf32>
    %140 = arith.select %137, %139, %138 : vector<16x16xi1>, vector<16x16xf32>
    %cst_78 = arith.constant dense<0.000000e+00> : vector<16xf32>
    %141 = vector.multi_reduction <add>, %140, %cst_78 [1] : vector<16x16xf32> to vector<16xf32>
    %142 = vector.shape_cast %141 : vector<16xf32> to vector<16x1xf32>
    %143 = arith.mulf %125, %126 : vector<8x16xf32>
    %cst_79 = arith.constant dense<0.000000e+00> : vector<8xf32>
    %144 = vector.multi_reduction <add>, %143, %cst_79 [1] : vector<8x16xf32> to vector<8xf32>
    %145 = vector.shape_cast %144 : vector<8xf32> to vector<8x1xf32>
    %cst_80 = arith.constant 7.000000e-02 : f32
    %146 = vector.broadcast %cst_80 : f32 to vector<8x1xf32>
    %147 = arith.divf %145, %146 : vector<8x1xf32>
    %148 = tpu.concatenate %147, %147 in 0 : vector<8x1xf32>, vector<8x1xf32> -> vector<16x1xf32>
    %149 = arith.subf %148, %132 : vector<16x1xf32>
    %150 = math.log %142 : vector<16x1xf32>
    %151 = arith.subf %149, %150 : vector<16x1xf32>
    %cst_81 = arith.constant dense<0.000000e+00> : vector<1xf32>
    %152 = vector.multi_reduction <add>, %151, %cst_81 [0] : vector<16x1xf32> to vector<1xf32>
    %153 = vector.shape_cast %152 : vector<1xf32> to vector<1x1xf32>
    %cst_82 = arith.constant -1.000000e+00 : f32
    %154 = vector.broadcast %cst_82 : f32 to vector<1x1xf32>
    %155 = arith.mulf %154, %153 : vector<1x1xf32>
    %cst_83 = arith.constant 1.600000e+01 : f32
    %156 = vector.broadcast %cst_83 : f32 to vector<1x1xf32>
    %157 = arith.divf %155, %156 : vector<1x1xf32>
    %158 = arith.addf %124, %157 : vector<1x1xf32>
    %159 = vector.extract_strided_slice %83 {offsets = [0, 0], sizes = [8, 16], strides = [1, 1]} : vector<16x16xf32> to vector<8x16xf32>
    %160 = vector.extract_strided_slice %83 {offsets = [8, 0], sizes = [8, 16], strides = [1, 1]} : vector<16x16xf32> to vector<8x16xf32>
    %161 = tpu.concatenate %159, %160 in 0 : vector<8x16xf32>, vector<8x16xf32> -> vector<16x16xf32>
    %cst_84 = arith.constant dense<0.000000e+00> : vector<16x16xf32>
    %162 = tpu.matmul %161, %161, %cst_84 {dimension_numbers = #tpu.dot_dimension_numbers<[1], [1], [0], [0], [0, 0, 1, 0], [], []>} : vector<16x16xf32>, vector<16x16xf32>, vector<16x16xf32> -> vector<16x16xf32>
    %cst_85 = arith.constant 7.000000e-02 : f32
    %163 = vector.broadcast %cst_85 : f32 to vector<16x16xf32>
    %164 = arith.divf %162, %163 : vector<16x16xf32>
    %cst_86 = arith.constant dense<0xFF800000> : vector<16xf32>
    %165 = vector.multi_reduction <maximumf>, %164, %cst_86 [1] : vector<16x16xf32> to vector<16xf32>
    %166 = vector.shape_cast %165 : vector<16xf32> to vector<16x1xf32>
    %167 = vector.broadcast %166 : vector<16x1xf32> to vector<16x16xf32>
    %168 = arith.subf %164, %167 : vector<16x16xf32>
    %169 = tpu.iota {dimensions = array<i32: 0>} : vector<16x16xi32>
    %170 = tpu.iota {dimensions = array<i32: 1>} : vector<16x16xi32>
    %171 = arith.cmpi eq, %169, %170 : vector<16x16xi32>
    %172 = math.exp %168 : vector<16x16xf32>
    %cst_87 = arith.constant 0.000000e+00 : f32
    %173 = vector.broadcast %cst_87 : f32 to vector<16x16xf32>
    %174 = arith.select %171, %173, %172 : vector<16x16xi1>, vector<16x16xf32>
    %cst_88 = arith.constant dense<0.000000e+00> : vector<16xf32>
    %175 = vector.multi_reduction <add>, %174, %cst_88 [1] : vector<16x16xf32> to vector<16xf32>
    %176 = vector.shape_cast %175 : vector<16xf32> to vector<16x1xf32>
    %177 = arith.mulf %159, %160 : vector<8x16xf32>
    %cst_89 = arith.constant dense<0.000000e+00> : vector<8xf32>
    %178 = vector.multi_reduction <add>, %177, %cst_89 [1] : vector<8x16xf32> to vector<8xf32>
    %179 = vector.shape_cast %178 : vector<8xf32> to vector<8x1xf32>
    %cst_90 = arith.constant 7.000000e-02 : f32
    %180 = vector.broadcast %cst_90 : f32 to vector<8x1xf32>
    %181 = arith.divf %179, %180 : vector<8x1xf32>
    %182 = tpu.concatenate %181, %181 in 0 : vector<8x1xf32>, vector<8x1xf32> -> vector<16x1xf32>
    %183 = arith.subf %182, %166 : vector<16x1xf32>
    %184 = math.log %176 : vector<16x1xf32>
    %185 = arith.subf %183, %184 : vector<16x1xf32>
    %cst_91 = arith.constant dense<0.000000e+00> : vector<1xf32>
    %186 = vector.multi_reduction <add>, %185, %cst_91 [0] : vector<16x1xf32> to vector<1xf32>
    %187 = vector.shape_cast %186 : vector<1xf32> to vector<1x1xf32>
    %cst_92 = arith.constant -1.000000e+00 : f32
    %188 = vector.broadcast %cst_92 : f32 to vector<1x1xf32>
    %189 = arith.mulf %188, %187 : vector<1x1xf32>
    %cst_93 = arith.constant 1.600000e+01 : f32
    %190 = vector.broadcast %cst_93 : f32 to vector<1x1xf32>
    %191 = arith.divf %189, %190 : vector<1x1xf32>
    %192 = vector.extract_strided_slice %91 {offsets = [0, 0], sizes = [8, 16], strides = [1, 1]} : vector<16x16xf32> to vector<8x16xf32>
    %193 = vector.extract_strided_slice %91 {offsets = [8, 0], sizes = [8, 16], strides = [1, 1]} : vector<16x16xf32> to vector<8x16xf32>
    %194 = tpu.concatenate %192, %193 in 0 : vector<8x16xf32>, vector<8x16xf32> -> vector<16x16xf32>
    %cst_94 = arith.constant dense<0.000000e+00> : vector<16x16xf32>
    %195 = tpu.matmul %194, %194, %cst_94 {dimension_numbers = #tpu.dot_dimension_numbers<[1], [1], [0], [0], [0, 0, 1, 0], [], []>} : vector<16x16xf32>, vector<16x16xf32>, vector<16x16xf32> -> vector<16x16xf32>
    %cst_95 = arith.constant 7.000000e-02 : f32
    %196 = vector.broadcast %cst_95 : f32 to vector<16x16xf32>
    %197 = arith.divf %195, %196 : vector<16x16xf32>
    %cst_96 = arith.constant dense<0xFF800000> : vector<16xf32>
    %198 = vector.multi_reduction <maximumf>, %197, %cst_96 [1] : vector<16x16xf32> to vector<16xf32>
    %199 = vector.shape_cast %198 : vector<16xf32> to vector<16x1xf32>
    %200 = vector.broadcast %199 : vector<16x1xf32> to vector<16x16xf32>
    %201 = arith.subf %197, %200 : vector<16x16xf32>
    %202 = tpu.iota {dimensions = array<i32: 0>} : vector<16x16xi32>
    %203 = tpu.iota {dimensions = array<i32: 1>} : vector<16x16xi32>
    %204 = arith.cmpi eq, %202, %203 : vector<16x16xi32>
    %205 = math.exp %201 : vector<16x16xf32>
    %cst_97 = arith.constant 0.000000e+00 : f32
    %206 = vector.broadcast %cst_97 : f32 to vector<16x16xf32>
    %207 = arith.select %204, %206, %205 : vector<16x16xi1>, vector<16x16xf32>
    %cst_98 = arith.constant dense<0.000000e+00> : vector<16xf32>
    %208 = vector.multi_reduction <add>, %207, %cst_98 [1] : vector<16x16xf32> to vector<16xf32>
    %209 = vector.shape_cast %208 : vector<16xf32> to vector<16x1xf32>
    %210 = arith.mulf %192, %193 : vector<8x16xf32>
    %cst_99 = arith.constant dense<0.000000e+00> : vector<8xf32>
    %211 = vector.multi_reduction <add>, %210, %cst_99 [1] : vector<8x16xf32> to vector<8xf32>
    %212 = vector.shape_cast %211 : vector<8xf32> to vector<8x1xf32>
    %cst_100 = arith.constant 7.000000e-02 : f32
    %213 = vector.broadcast %cst_100 : f32 to vector<8x1xf32>
    %214 = arith.divf %212, %213 : vector<8x1xf32>
    %215 = tpu.concatenate %214, %214 in 0 : vector<8x1xf32>, vector<8x1xf32> -> vector<16x1xf32>
    %216 = arith.subf %215, %199 : vector<16x1xf32>
    %217 = math.log %209 : vector<16x1xf32>
    %218 = arith.subf %216, %217 : vector<16x1xf32>
    %cst_101 = arith.constant dense<0.000000e+00> : vector<1xf32>
    %219 = vector.multi_reduction <add>, %218, %cst_101 [0] : vector<16x1xf32> to vector<1xf32>
    %220 = vector.shape_cast %219 : vector<1xf32> to vector<1x1xf32>
    %cst_102 = arith.constant -1.000000e+00 : f32
    %221 = vector.broadcast %cst_102 : f32 to vector<1x1xf32>
    %222 = arith.mulf %221, %220 : vector<1x1xf32>
    %cst_103 = arith.constant 1.600000e+01 : f32
    %223 = vector.broadcast %cst_103 : f32 to vector<1x1xf32>
    %224 = arith.divf %222, %223 : vector<1x1xf32>
    %225 = arith.addf %191, %224 : vector<1x1xf32>
    %226 = arith.mulf %83, %67 : vector<16x16xf32>
    %cst_104 = arith.constant dense<0.000000e+00> : vector<16xf32>
    %227 = vector.multi_reduction <add>, %226, %cst_104 [1] : vector<16x16xf32> to vector<16xf32>
    %228 = vector.shape_cast %227 : vector<16xf32> to vector<16x1xf32>
    %229 = math.absf %228 : vector<16x1xf32>
    %cst_105 = arith.constant dense<0.000000e+00> : vector<1xf32>
    %230 = vector.multi_reduction <add>, %229, %cst_105 [0] : vector<16x1xf32> to vector<1xf32>
    %231 = vector.shape_cast %230 : vector<1xf32> to vector<1x1xf32>
    %232 = arith.mulf %91, %75 : vector<16x16xf32>
    %cst_106 = arith.constant dense<0.000000e+00> : vector<16xf32>
    %233 = vector.multi_reduction <add>, %232, %cst_106 [1] : vector<16x16xf32> to vector<16xf32>
    %234 = vector.shape_cast %233 : vector<16xf32> to vector<16x1xf32>
    %235 = math.absf %234 : vector<16x1xf32>
    %cst_107 = arith.constant dense<0.000000e+00> : vector<1xf32>
    %236 = vector.multi_reduction <add>, %235, %cst_107 [0] : vector<16x1xf32> to vector<1xf32>
    %237 = vector.shape_cast %236 : vector<1xf32> to vector<1x1xf32>
    %238 = arith.addf %231, %237 : vector<1x1xf32>
    %239 = arith.mulf %83, %91 : vector<16x16xf32>
    %cst_108 = arith.constant dense<0.000000e+00> : vector<16xf32>
    %240 = vector.multi_reduction <add>, %239, %cst_108 [1] : vector<16x16xf32> to vector<16xf32>
    %241 = vector.shape_cast %240 : vector<16xf32> to vector<16x1xf32>
    %242 = math.absf %241 : vector<16x1xf32>
    %cst_109 = arith.constant dense<0.000000e+00> : vector<1xf32>
    %243 = vector.multi_reduction <add>, %242, %cst_109 [0] : vector<16x1xf32> to vector<1xf32>
    %244 = vector.shape_cast %243 : vector<1xf32> to vector<1x1xf32>
    %245 = arith.addf %238, %244 : vector<1x1xf32>
    %cst_110 = arith.constant 8.000000e+00 : f32
    %246 = vector.broadcast %cst_110 : f32 to vector<1x1xf32>
    %247 = arith.divf %245, %246 : vector<1x1xf32>
    %cst_111 = arith.constant 1.000000e+00 : f32
    %248 = vector.broadcast %cst_111 : f32 to vector<1x1xf32>
    %249 = arith.mulf %248, %225 : vector<1x1xf32>
    %250 = arith.addf %158, %249 : vector<1x1xf32>
    %cst_112 = arith.constant 1.000000e-03 : f32
    %251 = vector.broadcast %cst_112 : f32 to vector<1x1xf32>
    %252 = arith.mulf %251, %247 : vector<1x1xf32>
    %253 = arith.addf %250, %252 : vector<1x1xf32>
    %254 = tpu.iota {dimensions = array<i32: 1>} : vector<1x4xi32>
    %c0_i32 = arith.constant 0 : i32
    %255 = vector.broadcast %c0_i32 : i32 to vector<1x4xi32>
    %256 = arith.cmpi eq, %254, %255 : vector<1x4xi32>
    %cst_113 = arith.constant 0.000000e+00 : f32
    %257 = vector.shape_cast %253 : vector<1x1xf32> to vector<1x1xf32>
    %258 = vector.broadcast %257 : vector<1x1xf32> to vector<1x4xf32>
    %259 = vector.broadcast %cst_113 : f32 to vector<1x4xf32>
    %260 = arith.select %256, %258, %259 : vector<1x4xi1>, vector<1x4xf32>
    %c1_i32 = arith.constant 1 : i32
    %261 = vector.broadcast %c1_i32 : i32 to vector<1x4xi32>
    %262 = arith.cmpi eq, %254, %261 : vector<1x4xi32>
    %cst_114 = arith.constant 0.000000e+00 : f32
    %263 = vector.shape_cast %158 : vector<1x1xf32> to vector<1x1xf32>
    %264 = vector.broadcast %263 : vector<1x1xf32> to vector<1x4xf32>
    %265 = vector.broadcast %cst_114 : f32 to vector<1x4xf32>
    %266 = arith.select %262, %264, %265 : vector<1x4xi1>, vector<1x4xf32>
    %267 = arith.addf %260, %266 : vector<1x4xf32>
    %c2_i32 = arith.constant 2 : i32
    %268 = vector.broadcast %c2_i32 : i32 to vector<1x4xi32>
    %269 = arith.cmpi eq, %254, %268 : vector<1x4xi32>
    %cst_115 = arith.constant 0.000000e+00 : f32
    %270 = vector.shape_cast %225 : vector<1x1xf32> to vector<1x1xf32>
    %271 = vector.broadcast %270 : vector<1x1xf32> to vector<1x4xf32>
    %272 = vector.broadcast %cst_115 : f32 to vector<1x4xf32>
    %273 = arith.select %269, %271, %272 : vector<1x4xi1>, vector<1x4xf32>
    %274 = arith.addf %267, %273 : vector<1x4xf32>
    %c3_i32 = arith.constant 3 : i32
    %275 = vector.broadcast %c3_i32 : i32 to vector<1x4xi32>
    %276 = arith.cmpi eq, %254, %275 : vector<1x4xi32>
    %cst_116 = arith.constant 0.000000e+00 : f32
    %277 = vector.shape_cast %247 : vector<1x1xf32> to vector<1x1xf32>
    %278 = vector.broadcast %277 : vector<1x1xf32> to vector<1x4xf32>
    %279 = vector.broadcast %cst_116 : f32 to vector<1x4xf32>
    %280 = arith.select %276, %278, %279 : vector<1x4xi1>, vector<1x4xf32>
    %281 = arith.addf %274, %280 : vector<1x4xf32>
    %c0_117 = arith.constant 0 : index
    %c0_118 = arith.constant 0 : index
    %282 = vector.load %arg22[%c0_117, %c0_118] : memref<1x4xf32, #tpu.memory_space<vmem>>, vector<1x4xf32>
    tpu.vector_store %arg22[%c0_117, %c0_118], %281 {strides = array<i32>} : memref<1x4xf32, #tpu.memory_space<vmem>>, vector<1x4xf32>,
    return
  }
}

</mosaic_0001>

<bundles_post_ra>
// kernel: tpu_custom_call.1
= control target key start
LH: loop header
LB: loop body
LE: loop exit
PB: predicated region body
PF: predicated region fallthrough
CT: control target
= control target key end

     0   :  { %s2572_s0 = inlined_call_operand.vmem [shape: f32[8,16], index: 0, kind: input, shape index: {}]   ;;  %s2573_s1 = inlined_call_operand.vmem [shape: f32[8,12], index: 1, kind: input, shape index: {}]   ;;  %s2574_s2 = inlined_call_operand.vmem [shape: f32[8,16], index: 2, kind: input, shape index: {}]   ;;  %s2575_s3 = inlined_call_operand.vmem [shape: f32[8,12], index: 3, kind: input, shape index: {}]   ;;  %s2576_s4 = inlined_call_operand.vmem [shape: f32[16,32], index: 4, kind: input, shape index: {}]   ;;  %s2577_s5 = inlined_call_operand.vmem [shape: f32[1,32], index: 5, kind: input, shape index: {}]   ;;  %s2578_s6 = inlined_call_operand.vmem [shape: f32[32,16], index: 6, kind: input, shape index: {}]   ;;  %s2579_s7 = inlined_call_operand.vmem [shape: f32[1,16], index: 7, kind: input, shape index: {}]   ;;  %s2580_s8 = inlined_call_operand.vmem [shape: f32[12,32], index: 8, kind: input, shape index: {}]   ;;  %s2581_s9 = inlined_call_operand.vmem [shape: f32[1,32], index: 9, kind: input, shape index: {}]   ;;  %s2582_s10 = inlined_call_operand.vmem [shape: f32[32,16], index: 10, kind: input, shape index: {}]   ;;  %s2583_s11 = inlined_call_operand.vmem [shape: f32[1,16], index: 11, kind: input, shape index: {}]   ;;  %s2584_s12 = inlined_call_operand.vmem [shape: f32[16,32], index: 12, kind: input, shape index: {}]   ;;  %s2585_s13 = inlined_call_operand.vmem [shape: f32[16,32], index: 13, kind: input, shape index: {}]   ;;  %s2586_s14 = inlined_call_operand.vmem [shape: f32[1,32], index: 14, kind: input, shape index: {}]   ;;  %s2587_s15 = inlined_call_operand.vmem [shape: f32[32,16], index: 15, kind: input, shape index: {}]   ;;  %s2588_s16 = inlined_call_operand.vmem [shape: f32[1,16], index: 16, kind: input, shape index: {}]   ;;  %s2589_s17 = inlined_call_operand.vmem [shape: f32[12,32], index: 17, kind: input, shape index: {}]   ;;  %s2590_s18 = inlined_call_operand.vmem [shape: f32[16,32], index: 18, kind: input, shape index: {}]   ;;  %s2591_s19 = inlined_call_operand.vmem [shape: f32[1,32], index: 19, kind: input, shape index: {}]   ;;  %s2592_s20 = inlined_call_operand.vmem [shape: f32[32,16], index: 20, kind: input, shape index: {}]   ;;  %s2593_s21 = inlined_call_operand.vmem [shape: f32[1,16], index: 21, kind: input, shape index: {}]   ;;  %s2594_s22 = inlined_call_operand.hbm [shape: f32[1,4], index: 22, kind: output, shape index: {}]  }
   0x1   :  { %2597 = sst [smem:[#allocation5_spill]] %s2572_s0 }
   0x2   :  { %2598 = sst [smem:[#allocation6_spill]] %s2573_s1 }
   0x3   :  { %2599 = sst [smem:[#allocation7_spill]] %s2574_s2 }
   0x4   :  { %2600 = sst [smem:[#allocation8_spill]] %s2575_s3 }
   0x5   :  { %2601 = sst [smem:[#allocation9_spill]] %s2576_s4 }
   0x6   :  { %2602 = sst [smem:[#allocation10_spill]] %s2577_s5 }
   0x7   :  { %2603 = sst [smem:[#allocation11_spill]] %s2578_s6 }
   0x8   :  { %s2604_s29 = sld [smem:[#allocation9_spill]]  ;;  %v263_v1 = vld [vmem:[%s2580_s8 + $0x8] sm:$0xf]  ;;  %vm283_vm0 = vcmask 1043456   ;;  %v262_v3 = vld [vmem:[%s2580_s8] sm:$0xff]  ;;  %vm90_vm1 = vcmask 130048  }
   0x9   :  { %1840 = vmatprep.subr.msk.mxu0 %vm283_vm0, %v263_v1  ;;  %s2605_s25 = sld [smem:[#allocation5_spill]]  ;;  %vm276_vm2 = vcmask 97280  }
   0xa   :  { %1841 = vmatpush3.msk.msra.mxu0 %vm283_vm0, %v263_v1  ;;  %s2606_s27 = sld [smem:[#allocation6_spill]] }
   0xe   :  { %v77_v0 = vld [vmem:[%s2604_s29 + $0x8] sm:$0xff]  ;;  %v76_v2 = vld [vmem:[%s2604_s29] sm:$0xff] }
   0xf   :  { %1822 = vmatprep.subr.mxu1 %v77_v0  ;;  %v2159_v4 = vld [vmem:[%s2605_s25] sm:$0xff] }
  0x10   :  { %1823 = vmatpush3.msra.mxu1 %v77_v0  ;;  %v2165_v5 = vld [vmem:[%s2606_s27] sm:$0xff] }
  0x11   :  { %27 = vsyncpa [#allocation3], 0  ;;  %1824 = vmatprep.subr.mxu1 %v76_v2  ;;  %1842 = vmatprep.subr.mxu0 %v262_v3  ;;  %s2607_s28 = sld [smem:[#allocation7_spill]]  ;;  %v268_v9 = vld [vmem:[%s2582_s10 + $0x18] sm:$0xff]  ;;  %v267_v11 = vld [vmem:[%s2582_s10 + $0x10] sm:$0xff]  ;;  %vm180_vm3 = vcmask 261120  }
  0x12   :  { %s2608_s4 = sld [smem:[#allocation8_spill]]  ;;  %1825 = vmatpush3.msra.mxu1 %v76_v2  ;;  %1826 = vmatprep.mubr.msk.f32.mxu1 %vm90_vm1, %v2159_v4  ;;  %v266_v13 = vld [vmem:[%s2582_s10 + $0x8] sm:$0xff]  ;;  %v265_v15 = vld [vmem:[%s2582_s10] sm:$0xff]  ;;  %v625_v56 = vld [vmem:[%s2587_s15 + $0x18] sm:$0xff] }
  0x13   :  { %1843 = vmatpush3.msra.mxu0 %v262_v3  ;;  %1844 = vmatprep.mubr.msk.f32.mxu0 %vm276_vm2, %v2165_v5  ;;  %s2609_s1 = sld [smem:[#allocation11_spill]]  ;;  %v1718_v16 = vld [vmem:[%s2581_s9] ss:$0 sm:$0xff]  ;;  %v454_v30 = vld [vmem:[%s2585_s13 + $0x8] sm:$0xff]  ;;  %v624_v57 = vld [vmem:[%s2587_s15 + $0x10] sm:$0xff] }
  0x14   :  { %1847 = vmatprep.subr.mxu0 %v268_v9  ;;  %s2610_s25 = sld [smem:[#allocation10_spill]]  ;;  %v453_v31 = vld [vmem:[%s2585_s13] sm:$0xff]  ;;  %v452_v32 = vld [vmem:[%s2584_s12 + $0x8] sm:$0xff]  ;;  %v2302_v60 = vld [vmem:[%s2592_s20 + $0x18] sm:$0xff] }
  0x15   :  { %v1715_v33 = vld [vmem:[%s2579_s7] ss:$0 sm:$0xff]  ;;  %v717_v50 = vld [vmem:[%s2590_s18 + $0x8] sm:$0xff] }
  0x16   :  { %v1722_v36 = vld [vmem:[%s2583_s11] ss:$0 sm:$0xff]  ;;  %v715_v54 = vld [vmem:[%s2589_s17 + $0x8] sm:$0xf] }
  0x17   :  { %v2170_v6 = vld [vmem:[%s2607_s28] sm:$0xff]  ;;  %v623_v58 = vld [vmem:[%s2587_s15 + $0x8] sm:$0xff] }
  0x18   :  { %v2175_v7 = vld [vmem:[%s2608_s4] sm:$0xff]  ;;  %1827 = vmatmul.mubr.msk.f32.vlgmr.msra.gmra.mxu1 %vm90_vm1, %v2170_v6 }
  0x19   :  { %1845 = vmatmul.mubr.msk.f32.vlgmr.msra.gmra.mxu0 %vm276_vm2, %v2175_v7  ;;  %v82_v8 = vld [vmem:[%s2609_s1 + $0x18] sm:$0xff]  ;;  %v81_v10 = vld [vmem:[%s2609_s1 + $0x10] sm:$0xff]  ;;  %v80_v12 = vld [vmem:[%s2609_s1 + $0x8] sm:$0xff] }
  0x1a   :  { %1829 = vmatprep.subr.mxu1 %v82_v8  ;;  %1848 = vmatpush3.msra.mxu0 %v268_v9  ;;  %v79_v14 = vld [vmem:[%s2609_s1] sm:$0xff] }
  0x1b   :  { %1830 = vmatpush3.msra.mxu1 %v82_v8  ;;  %1849 = vmatprep.subr.mxu0 %v267_v11  ;;  %v1712_v17 = vld [vmem:[%s2610_s25] ss:$0 sm:$0xff] }
  0x1c   :  { %1831 = vmatprep.subr.mxu1 %v81_v10  ;;  %1850 = vmatpush3.msra.mxu0 %v267_v11  ;;  %v451_v45 = vld [vmem:[%s2584_s12] sm:$0xff] }
  0x1d   :  { %1832 = vmatpush3.msra.mxu1 %v81_v10  ;;  %1851 = vmatprep.subr.mxu0 %v266_v13  ;;  %v716_v52 = vld [vmem:[%s2590_s18] sm:$0xff] }
  0x1e   :  { %1833 = vmatprep.subr.mxu1 %v80_v12  ;;  %1852 = vmatpush3.msra.mxu0 %v266_v13  ;;  %v714_v55 = vld [vmem:[%s2589_s17] sm:$0xff] }
  0x1f   :  { %1834 = vmatpush3.msra.mxu1 %v80_v12  ;;  %1853 = vmatprep.subr.mxu0 %v265_v15  ;;  %v622_v59 = vld [vmem:[%s2587_s15] sm:$0xff] }
  0x20   :  { %1835 = vmatprep.subr.mxu1 %v79_v14  ;;  %1854 = vmatpush3.msra.mxu0 %v265_v15 }
  0x21   :  { %1836 = vmatpush3.msra.mxu1 %v79_v14  ;;  %1872 = vmatprep.subr.mxu0 %v625_v56 }
  0x22   :  { %1858 = vmatprep.subr.mxu1 %v454_v30 }
  0xd8   :  { %v1828_v18 = vpop.f32.mrf.mxu1 }
  0xd9   :  { %v1846_v19 = vpop.f32.mrf.mxu0  ;;  %v169_v21 = vadd.f32 %v1828_v18, %v1712_v17 }
  0xda   :  { %v359_v20 = vadd.f32 %v1846_v19, %v1718_v16  ;;  %v163_v22 = vpop.f32.mrf.mxu1 }
  0xdb   :  { %v353_v23 = vpop.f32.mrf.mxu0  ;;  %v164_v24 = vadd.f32 %v1712_v17, %v163_v22  ;;  %v173_v29 = vmax.f32 %v169_v21, 0.0 }
  0xdc   :  { %v354_v25 = vadd.f32 %v1718_v16, %v353_v23  ;;  %v363_v26 = vmax.f32 %v359_v20, 0.0 }
  0xdd   :  { %v172_v27 = vmax.f32 %v164_v24, 0.0 }
  0xde   :  { %v362_v28 = vmax.f32 %v354_v25, 0.0 }
  0xdf   :  { %1837 = vmatprep.mubr.msk.f32.mxu1 %vm180_vm3, %v172_v27 }
  0xe0   :  { %1855 = vmatprep.mubr.msk.f32.mxu0 %vm180_vm3, %v362_v28  ;;  %1838 = vmatmul.mubr.msk.f32.vlgmr.msra.gmra.mxu1 %vm180_vm3, %v173_v29 }
  0xe1   :  { %1856 = vmatmul.mubr.msk.f32.vlgmr.msra.gmra.mxu0 %vm180_vm3, %v363_v26  ;;  %1859 = vmatpush3.msra.mxu1 %v454_v30 }
  0xe2   :  { %1860 = vmatprep.subr.mxu1 %v453_v31  ;;  %1873 = vmatpush3.msra.mxu0 %v625_v56 }
  0xe3   :  { %1861 = vmatpush3.msra.mxu1 %v453_v31  ;;  %1874 = vmatprep.subr.mxu0 %v624_v57 }
  0xe4   :  { %1865 = vmatprep.subr.mxu1 %v452_v32  ;;  %1875 = vmatpush3.msra.mxu0 %v624_v57 }
  0xe5   :  { %1876 = vmatprep.subr.mxu0 %v623_v58 }
  0xe6   :  { %1877 = vmatpush3.msra.mxu0 %v623_v58 }
  0xe7   :  { %1878 = vmatprep.subr.mxu0 %v622_v59 }
  0xe8   :  { %1879 = vmatpush3.msra.mxu0 %v622_v59 }
  0xe9   :  { %1897 = vmatprep.subr.mxu0 %v2302_v60 }
 0x1a0   :  { %v1839_v34 = vpop.f32.mrf.mxu1 }
 0x1a1   :  { %v1857_v35 = vpop.f32.mrf.mxu0  ;;  %v2234_v37 = vadd.f32 %v1839_v34, %v1715_v33 }
 0x1a2   :  { %v2236_v38 = vadd.f32 %v1857_v35, %v1722_v36  ;;  %v253_v39 = vpop.f32.mrf.mxu1 }
 0x1a3   :  { %v442_v40 = vpop.f32.mrf.mxu0  ;;  %v2238_v41 = vadd.f32 %v1715_v33, %v253_v39  ;;  %v981_v43 = vmul.f32 %v2234_v37, %v2234_v37  ;;  %v1729_v33 = vld [vmem:[%s2586_s14] ss:$0 sm:$0xff] }
 0x1a4   :  { %v2240_v42 = vadd.f32 %v1722_v36, %v442_v40  ;;  %v1009_v48 = vmul.f32 %v2236_v38, %v2236_v38 }
 0x1a5   :  { %1862 = vmatprep.mubr.msk.f32.mxu1 %vm90_vm1, %v2238_v41  ;;  %v985_v44 = vsel %vm90_vm1, %v981_v43, 0.0  ;;  %v980_v47 = vmul.f32 %v2238_v41, %v2238_v41 }
 0x1a6   :  { %v1008_v46 = vmul.f32 %v2240_v42, %v2240_v42  ;;  %986 = vadd.xlane.f32.xlu1 %v985_v44  ;;  %1863 = vmatmul.mubr.msk.f32.vlgmr.msra.gmra.mxu1 %vm90_vm1, %v2234_v37  ;;  %v1013_v53 = vsel %vm90_vm1, %v1009_v48, 0.0 }
 0x1a7   :  { %1866 = vmatpush3.msra.mxu1 %v452_v32  ;;  %1869 = vmatprep.mubr.msk.f32.mxu1 %vm90_vm1, %v2159_v4  ;;  %v982_v51 = vsel %vm90_vm1, %v980_v47, 0.0  ;;  %v890_v47 = vld [vmem:[%s2592_s20 + $0x10] sm:$0xff] }
 0x1a8   :  { %v1010_v49 = vsel %vm90_vm1, %v1008_v46, 0.0  ;;  %1867 = vmatprep.subr.mxu1 %v451_v45  ;;  %v1738_v46 = vld [vmem:[%s2591_s19] ss:$0 sm:$0xff] }
 0x1a9   :  { %1011 = vadd.xlane.f32.xlu0 %v1010_v49  ;;  %1868 = vmatpush3.msra.mxu1 %v451_v45 }
 0x1aa   :  { %1883 = vmatprep.subr.mxu1 %v717_v50  ;;  %983 = vadd.xlane.f32.xlu1 %v982_v51 }
 0x1ab   :  { %1870 = vmatmul.mubr.msk.f32.vlgmr.msra.gmra.mxu1 %vm90_vm1, %v2170_v6 }
 0x1ac   :  { %1884 = vmatpush3.msra.mxu1 %v717_v50  ;;  %1887 = vmatprep.mubr.msk.f32.mxu1 %vm90_vm1, %v2240_v42  ;;  %v889_v50 = vld [vmem:[%s2592_s20 + $0x8] sm:$0xff] }
 0x1ad   :  { %1885 = vmatprep.subr.mxu1 %v716_v52  ;;  %1014 = vadd.xlane.f32.xlu0 %v1013_v53 }
 0x1ae   :  { %1886 = vmatpush3.msra.mxu1 %v716_v52 }
 0x1af   :  { %1890 = vmatprep.subr.msk.mxu1 %vm283_vm0, %v715_v54  ;;  %1888 = vmatmul.mubr.msk.f32.vlgmr.msra.gmra.mxu1 %vm90_vm1, %v2236_v38 }
 0x1b0   :  { %1891 = vmatpush3.msk.msra.mxu1 %vm283_vm0, %v715_v54  ;;  %1894 = vmatprep.mubr.msk.f32.mxu1 %vm276_vm2, %v2165_v5  ;;  %v888_v54 = vld [vmem:[%s2592_s20] sm:$0xff] }
 0x1b1   :  { %1892 = vmatprep.subr.mxu1 %v714_v55 }
 0x1b2   :  { %1893 = vmatpush3.msra.mxu1 %v714_v55 }
 0x1b3   :  { %1895 = vmatmul.mubr.msk.f32.vlgmr.msra.gmra.mxu1 %vm276_vm2, %v2175_v7 }
 0x22f   :  { %v987_v61 = vpop.xlane.xlu1 %986 }
 0x230   :  { %vm997_vm9 = vcmp.eq.f32.partialorder %v987_v61, inf  ;;  %v1000_v24 = vand.u32 2147483648, %v987_v61  ;;  %vm999_vm11 = vcmp.eq.f32.partialorder %v987_v61, 0.0 }
 0x232   :  { %v1012_v62 = vpop.xlane.xlu0 %1011 }
 0x233   :  { %1940 = vrsqrt.f32 %v1012_v62  ;;  %v984_v63 = vpop.xlane.xlu1 %983  ;;  %vm1018_vm4 = vcmp.eq.f32.partialorder %v1012_v62, inf  ;;  %v1021_v3 = vand.u32 2147483648, %v1012_v62  ;;  %vm1020_vm5 = vcmp.eq.f32.partialorder %v1012_v62, 0.0 }
 0x234   :  { %1942 = vrsqrt.f32 %v984_v63  ;;  %vm990_vm6 = vcmp.eq.f32.partialorder %v984_v63, inf  ;;  %v993_v7 = vand.u32 2147483648, %v984_v63  ;;  %vm992_vm7 = vcmp.eq.f32.partialorder %v984_v63, 0.0 }
 0x236   :  { %v1015_v12 = vpop.xlane.xlu0 %1014 }
 0x237   :  { %vm1025_vm8 = vcmp.eq.f32.partialorder %v1015_v12, inf  ;;  %v1028_v23 = vand.u32 2147483648, %v1015_v12  ;;  %vm1027_vm10 = vcmp.eq.f32.partialorder %v1015_v12, 0.0 }
 0x240   :  { %v1941_v0 = vpop.eup %1940 }
 0x241   :  { %v1017_v1 = vmul.f32 %v1941_v0, %v1012_v62  ;;  %v1943_v2 = vpop.eup %1942 }
 0x242   :  { %v989_v5 = vmul.f32 %v1943_v2, %v984_v63 }
 0x243   :  { %v1019_v4 = vsel %vm1018_vm4, %v1012_v62, %v1017_v1 }
 0x244   :  { %v1022_v6 = vsel %vm1020_vm5, %v1021_v3, %v1019_v4  ;;  %v991_v9 = vsel %vm990_vm6, %v984_v63, %v989_v5  ;;  %v1739_v4 = vld [vmem:[%s2593_s21] ss:$0 sm:$0xff] }
 0x245   :  { %v1030_v8 = vmax.f32 %v1022_v6, 1e-12  ;;  %v994_v10 = vsel %vm992_vm7, %v993_v7, %v991_v9 }
 0x246   :  { %v1002_v11 = vmax.f32 %v994_v10, 1e-12 }
 0x247   :  { %1944 = vrcp.f32 %v1030_v8 }
 0x248   :  { %1946 = vrcp.f32 %v1002_v11 }
 0x249   :  { %1948 = vrsqrt.f32 %v1015_v12 }
 0x24a   :  { %1950 = vrsqrt.f32 %v987_v61 }
 0x254   :  { %v1945_v13 = vpop.eup %1944 }
 0x255   :  { %v2306_v14 = vmul.f32 %v1945_v13, %v2240_v42  ;;  %v1947_v15 = vpop.eup %1946 }
 0x256   :  { %v2311_v16 = vmul.f32 %v1947_v15, %v2238_v41  ;;  %v1949_v17 = vpop.eup %1948 }
 0x257   :  { %1908 = vmatprep.subr.msk.mxu1 %vm90_vm1, %v2306_v14  ;;  %v1951_v18 = vpop.eup %1950  ;;  %v1024_v19 = vmul.f32 %v1949_v17, %v1015_v12 }
 0x258   :  { %1909 = vmatpush3.xpose.msk.msra.mxu1 %vm90_vm1, %v2306_v14  ;;  %1912 = vmatprep.mubr.msk.f32.mxu1 %vm90_vm1, %v2311_v16  ;;  %v996_v20 = vmul.f32 %v1951_v18, %v987_v61 }
 0x259   :  { %1910 = vmatprep.subr.msk.mxu1 %vm90_vm1, %v2311_v16  ;;  %v1026_v21 = vsel %vm1025_vm8, %v1015_v12, %v1024_v19 }
 0x25a   :  { %v998_v22 = vsel %vm997_vm9, %v987_v61, %v996_v20  ;;  %v1029_v25 = vsel %vm1027_vm10, %v1028_v23, %v1026_v21 }
 0x25b   :  { %v1001_v26 = vsel %vm999_vm11, %v1000_v24, %v998_v22  ;;  %v1031_v28 = vmax.f32 %v1029_v25, 1e-12  ;;  %vm1696_vm11 = vcmask 24576  }
 0x25c   :  { %1911 = vmatpush3.xpose.msk.msra.mxu1 %vm90_vm1, %v2311_v16  ;;  %v1003_v29 = vmax.f32 %v1001_v26, 1e-12 }
 0x25d   :  { %1952 = vrcp.f32 %v1031_v28 }
 0x25e   :  { %1954 = vrcp.f32 %v1003_v29 }
 0x25f   :  { %1913 = vmatmul.mubr.msk.f32.vlgmr.msra.gmra.mxu1 %vm90_vm1, %v2306_v14 }
 0x266   :  { %v1864_v27 = vpop.f32.mrf.mxu1 }
 0x268   :  { %v527_v30 = vpop.f32.mrf.mxu1 }
 0x26a   :  { %v1953_v52 = vpop.eup %1952 }
 0x26b   :  { %v1871_v31 = vpop.f32.mrf.mxu1  ;;  %v1955_v55 = vpop.eup %1954  ;;  %v2342_v58 = vmul.f32 %v1953_v52, %v2236_v38 }
 0x26c   :  { %v608_v32 = vadd.f32 %v1871_v31, %v1864_v27  ;;  %v2346_v59 = vmul.f32 %v1955_v55, %v2234_v37  ;;  %v1730_v37 = vld [vmem:[%s2588_s16] ss:$0 sm:$0xff]  ;;  %s2027_s16 = smov [#allocation2]  }
 0x26d   :  { %v602_v34 = vpop.f32.mrf.mxu1  ;;  %s1704_s21 = sshll.u32 %s2027_s16, 4  ;;  %s1705_s21 = int_to_ptr.vmem [resolvable:$true] %s1704_s21 }
 0x26e   :  { %v603_v35 = vadd.f32 %v602_v34, %v527_v30  ;;  %v619_v36 = vadd.f32 %v1729_v33, %v608_v32  ;;  %s2004_s0 = scalar_lea.vmem %s1705_s21, 16  ;;  %s2008_s23 = scalar_lea.vmem %s1705_s21, 32 }
 0x26f   :  { %v1889_v39 = vpop.f32.mrf.mxu1  ;;  %p2005_p0 = scmp.ne.s32.totalorder %s1705_s21, %s2004_s0  ;;  %p2009_p1 = scmp.lt.s32.totalorder %s1705_s21, %s1705_s21 }
 0x270   :  { %v618_v40 = vadd.f32 %v1729_v33, %v603_v35  ;;  %v621_v43 = vmax.f32 %v619_v36, 0.0  ;;  %p2010_p2 = scmp.lt.s32.totalorder %s2008_s23, %s2004_s0 }
 0x271   :  { %v790_v41 = vpop.f32.mrf.mxu1 }
 0x272   :  { %v620_v42 = vmax.f32 %v618_v40, 0.0  ;;  %p2011_p3 = por %p2010_p2, %p2009_p1 }
 0x273   :  { %v1896_v44 = vpop.f32.mrf.mxu1 }
 0x274   :  { %v874_v45 = vadd.f32 %v1896_v44, %v1889_v39  ;;  %1880 = vmatprep.mubr.msk.f32.mxu0 %vm180_vm3, %v620_v42  ;;  %p2012_p4 = pnand %p2011_p3, %p2005_p0 }
 0x275   :  { %1881 = vmatmul.mubr.msk.f32.vlgmr.msra.gmra.mxu0 %vm180_vm3, %v621_v43  ;;  %v868_v48 = vpop.f32.mrf.mxu1 }
 0x276   :  { %v869_v49 = vadd.f32 %v868_v48, %v790_v41  ;;  %1898 = vmatpush3.msra.mxu0 %v2302_v60  ;;  %v885_v51 = vadd.f32 %v1738_v46, %v874_v45 }
 0x277   :  { %1899 = vmatprep.subr.mxu0 %v890_v47 }
 0x278   :  { %v884_v53 = vadd.f32 %v1738_v46, %v869_v49  ;;  %1900 = vmatpush3.msra.mxu0 %v890_v47  ;;  %v887_v57 = vmax.f32 %v885_v51, 0.0 }
 0x279   :  { %1901 = vmatprep.subr.mxu0 %v889_v50 }
 0x27a   :  { %v886_v56 = vmax.f32 %v884_v53, 0.0  ;;  %1902 = vmatpush3.msra.mxu0 %v889_v50 }
 0x27b   :  { %1903 = vmatprep.subr.mxu0 %v888_v54 }
 0x27c   :  { %1904 = vmatpush3.msra.mxu0 %v888_v54  ;;  %1905 = vmatprep.mubr.msk.f32.mxu0 %vm180_vm3, %v886_v56 }
 0x27d   :  { %1915 = vmatprep.subr.msk.mxu0 %vm90_vm1, %v2342_v58  ;;  %1906 = vmatmul.mubr.msk.f32.vlgmr.msra.gmra.mxu0 %vm180_vm3, %v887_v57 }
 0x27e   :  { %1916 = vmatpush3.xpose.msk.msra.mxu0 %vm90_vm1, %v2342_v58  ;;  %1919 = vmatprep.mubr.msk.f32.mxu0 %vm90_vm1, %v2346_v59 }
 0x27f   :  { %1917 = vmatprep.subr.msk.mxu0 %vm90_vm1, %v2346_v59 }
 0x282   :  { %1918 = vmatpush3.xpose.msk.msra.mxu0 %vm90_vm1, %v2346_v59 }
 0x285   :  { %1920 = vmatmul.mubr.msk.f32.vlgmr.msra.gmra.mxu0 %vm90_vm1, %v2342_v58 }
 0x31f   :  { %v1914_v61 = vpop.f32.mrf.mxu1 }
 0x320   :  { %v2390_v18 = vmul.f32 14.285714, %v1914_v61 }
 0x321   :  { %v1164_v3 = vpop.f32.mrf.mxu1 }
 0x322   :  { %v2376_v6 = vmul.f32 14.285714, %v1164_v3  ;;  %v1179_v24 = vsel %vm90_vm1, %v2390_v18, -inf }
 0x324   :  { %v1176_v13 = vsel %vm90_vm1, %v2376_v6, -inf }
 0x335   :  { %v1882_v38 = vpop.f32.mrf.mxu0 }
 0x336   :  { %v2364_v60 = vadd.f32 %v1882_v38, %v1730_v37 }
 0x337   :  { %v705_v62 = vpop.f32.mrf.mxu0 }
 0x338   :  { %v2366_v63 = vadd.f32 %v1730_v37, %v705_v62  ;;  %v1037_v0 = vmul.f32 %v2364_v60, %v2364_v60 }
 0x33a   :  { %v1041_v1 = vsel %vm90_vm1, %v1037_v0, 0.0  ;;  %v1036_v2 = vmul.f32 %v2366_v63, %v2366_v63 }
 0x33b   :  { %1042 = vadd.xlane.f32.xlu0 %v1041_v1 }
 0x33c   :  { %v1038_v8 = vsel %vm90_vm1, %v1036_v2, 0.0 }
 0x33d   :  { %v1907_v5 = vpop.f32.mrf.mxu0 }
 0x33e   :  { %v2378_v7 = vadd.f32 %v1907_v5, %v1739_v4 }
 0x33f   :  { %v971_v9 = vpop.f32.mrf.mxu0  ;;  %1039 = vadd.xlane.f32.xlu0 %v1038_v8 }
 0x340   :  { %v2381_v10 = vadd.f32 %v1739_v4, %v971_v9  ;;  %v1065_v11 = vmul.f32 %v2378_v7, %v2378_v7 }
 0x342   :  { %v1069_v12 = vsel %vm90_vm1, %v1065_v11, 0.0  ;;  %v1064_v15 = vmul.f32 %v2381_v10, %v2381_v10 }
 0x343   :  { %1070 = vadd.xlane.f32.xlu1 %v1069_v12  ;;  %1177 = vmax.xlane.f32.xlu0 %v1176_v13 }
 0x344   :  { %v1066_v19 = vsel %vm90_vm1, %v1064_v15, 0.0 }
 0x345   :  { %v1921_v17 = vpop.f32.mrf.mxu0 }
 0x346   :  { %v2395_v22 = vmul.f32 14.285714, %v1921_v17 }
 0x347   :  { %v1301_v20 = vpop.f32.mrf.mxu0  ;;  %1067 = vadd.xlane.f32.xlu1 %v1066_v19 }
 0x348   :  { %v2393_v21 = vmul.f32 14.285714, %v1301_v20  ;;  %v1315_v25 = vsel %vm90_vm1, %v2395_v22, -inf }
 0x34a   :  { %v1312_v23 = vsel %vm90_vm1, %v2393_v21, -inf }
 0x34b   :  { %1313 = vmax.xlane.f32.xlu0 %v1312_v23  ;;  %1180 = vmax.xlane.f32.xlu1 %v1179_v24 }
 0x34f   :  { %1316 = vmax.xlane.f32.xlu1 %v1315_v25 }
 0x3c4   :  { %v1043_v26 = vpop.xlane.xlu0 %1042 }
 0x3c5   :  { %1956 = vrsqrt.f32 %v1043_v26  ;;  %vm1053_vm12 = vcmp.eq.f32.partialorder %v1043_v26, inf  ;;  %v1056_v32 = vand.u32 2147483648, %v1043_v26  ;;  %vm1055_vm13 = vcmp.eq.f32.partialorder %v1043_v26, 0.0 }
 0x3c8   :  { %v1040_v27 = vpop.xlane.xlu0 %1039 }
 0x3c9   :  { %1958 = vrsqrt.f32 %v1040_v27  ;;  %vm1046_vm14 = vcmp.eq.f32.partialorder %v1040_v27, inf  ;;  %v1049_v40 = vand.u32 2147483648, %v1040_v27  ;;  %vm1048_vm15 = vcmp.eq.f32.partialorder %v1040_v27, 0.0 }
 0x3cc   :  { %v1071_v28 = vpop.xlane.xlu1 %1070  ;;  %v2457_v5 = vpop.xlane.xlu0 %1177 }
 0x3cd   :  { %1960 = vrsqrt.f32 %v1071_v28  ;;  %vm1081_vm0 = vcmp.eq.f32.partialorder %v1071_v28, inf  ;;  %v1084_v46 = vand.u32 2147483648, %v1071_v28  ;;  %vm1083_vm2 = vcmp.eq.f32.partialorder %v1071_v28, 0.0 }
 0x3ce   :  { %v1182_v9 = vsub.f32 %v2376_v6, %v2457_v5 }
 0x3d0   :  { %v1068_v29 = vpop.xlane.xlu1 %1067  ;;  %v1191_v13 = vmul.f32 1.442695, %v1182_v9 }
 0x3d1   :  { %1962 = vrsqrt.f32 %v1068_v29  ;;  %vm1074_vm3 = vcmp.eq.f32.partialorder %v1068_v29, inf  ;;  %v1077_v52 = vand.u32 2147483648, %v1068_v29  ;;  %vm1076_vm4 = vcmp.eq.f32.partialorder %v1068_v29, 0.0 }
 0x3d2   :  { %v1957_v30 = vpop.eup %1956 }
 0x3d3   :  { %v1052_v31 = vmul.f32 %v1957_v30, %v1043_v26 }
 0x3d4   :  { %v2455_v4 = vpop.xlane.xlu1 %1180 }
 0x3d5   :  { %v1054_v33 = vsel %vm1053_vm12, %v1043_v26, %v1052_v31 }
 0x3d6   :  { %v1959_v34 = vpop.eup %1958  ;;  %v1057_v35 = vsel %vm1055_vm13, %v1056_v32, %v1054_v33 }
 0x3d7   :  { %v1059_v36 = vmax.f32 %v1057_v35, 1e-12  ;;  %v1045_v39 = vmul.f32 %v1959_v34, %v1040_v27 }
 0x3d8   :  { %v2461_v8 = vpop.xlane.xlu1 %1316 }
 0x3d9   :  { %1964 = vrcp.f32 %v1059_v36  ;;  %v1047_v41 = vsel %vm1046_vm14, %v1040_v27, %v1045_v39  ;;  %v1319_v12 = vsub.f32 %v2395_v22, %v2461_v8 }
 0x3da   :  { %v1961_v42 = vpop.eup %1960  ;;  %v1050_v43 = vsel %vm1048_vm15, %v1049_v40, %v1047_v41 }
 0x3db   :  { %v1058_v44 = vmax.f32 %v1050_v43, 1e-12  ;;  %v1080_v45 = vmul.f32 %v1961_v42, %v1071_v28  ;;  %v1322_v17 = vmul.f32 1.442695, %v1319_v12 }
 0x3dd   :  { %1966 = vrcp.f32 %v1058_v44  ;;  %v1082_v47 = vsel %vm1081_vm0, %v1071_v28, %v1080_v45 }
 0x3de   :  { %v1963_v48 = vpop.eup %1962  ;;  %v1085_v49 = vsel %vm1083_vm2, %v1084_v46, %v1082_v47 }
 0x3df   :  { %v1087_v50 = vmax.f32 %v1085_v49, 1e-12  ;;  %v1073_v51 = vmul.f32 %v1963_v48, %v1068_v29 }
 0x3e1   :  { %1968 = vrcp.f32 %v1087_v50  ;;  %v1075_v53 = vsel %vm1074_vm3, %v1068_v29, %v1073_v51 }
 0x3e2   :  { %v1078_v54 = vsel %vm1076_vm4, %v1077_v52, %v1075_v53 }
 0x3e3   :  { %v1086_v55 = vmax.f32 %v1078_v54, 1e-12 }
 0x3e5   :  { %1970 = vrcp.f32 %v1086_v55 }
 0x3e6   :  { %v1965_v56 = vpop.eup %1964 }
 0x3e7   :  { %v2404_v57 = vmul.f32 %v1965_v56, %v2364_v60 }
 0x3e9   :  { %1922 = vmatprep.subr.msk.mxu1 %vm90_vm1, %v2404_v57 }
 0x3ea   :  { %v1967_v37 = vpop.eup %1966  ;;  %1923 = vmatpush3.xpose.msk.msra.mxu1 %vm90_vm1, %v2404_v57 }
 0x3eb   :  { %v2411_v38 = vmul.f32 %v1967_v37, %v2366_v63 }
 0x3ed   :  { %1924 = vmatprep.subr.msk.mxu1 %vm90_vm1, %v2411_v38  ;;  %1926 = vmatprep.mubr.msk.f32.mxu1 %vm90_vm1, %v2411_v38  ;;  %v2419_v60 = vmul.f32 %v2404_v57, %v2411_v38 }
 0x3ee   :  { %v1969_v61 = vpop.eup %1968  ;;  %1925 = vmatpush3.xpose.msk.msra.mxu1 %vm90_vm1, %v2411_v38 }
 0x3ef   :  { %v2424_v62 = vmul.f32 %v1969_v61, %v2378_v7  ;;  %v1183_v7 = vsub.f32 %v2390_v18, %v2455_v4  ;;  %v1184_v18 = vlaneseq }
 0x3f1   :  { %1927 = vmatmul.mubr.msk.f32.vlgmr.msra.gmra.mxu1 %vm90_vm1, %v2404_v57  ;;  %1929 = vmatprep.subr.msk.mxu0 %vm90_vm1, %v2424_v62  ;;  %v2432_v63 = vmul.f32 %v2424_v62, %v2404_v57  ;;  %v1193_v11 = vmul.f32 1.442695, %v1183_v7  ;;  %v2472_v26 = vshrl.u32 %v1184_v18, 7  ;;  %v2476_v27 = vand.u32 127, %v1184_v18 }
 0x3f2   :  { %v1971_v0 = vpop.eup %1970  ;;  %1930 = vmatpush3.xpose.msk.msra.mxu0 %vm90_vm1, %v2424_v62 }
 0x3f3   :  { %v2437_v1 = vmul.f32 %v1971_v0, %v2381_v10  ;;  %v2465_v10 = vpop.xlane.xlu0 %1313  ;;  %1972 = vpow2.f32 %v1193_v11  ;;  %vm1189_vm6 = vcmp.eq.s32.totalorder %v2472_v26, %v2476_v27  ;;  %vm1677_vm7 = vcmp.eq.s32.totalorder %v2476_v27, 1 }
 0x3f4   :  { %v1318_v15 = vsub.f32 %v2393_v21, %v2465_v10  ;;  %1974 = vpow2.f32 %v1191_v13  ;;  %v1186_v21 = vadd.s32 8, %v2472_v26  ;;  %v1461_v26 = vsel %vm90_vm1, %v2419_v60, 0.0 }
 0x3f5   :  { %1931 = vmatprep.subr.msk.mxu0 %vm90_vm1, %v2437_v1  ;;  %1933 = vmatprep.mubr.msk.f32.mxu0 %vm90_vm1, %v2437_v1  ;;  %v2445_v2 = vmul.f32 %v2424_v62, %v2437_v1  ;;  %v2449_v3 = vmul.f32 %v2437_v1, %v2411_v38  ;;  %1976 = vpow2.f32 %v1322_v17  ;;  %vm1670_vm8 = vcmp.eq.s32.totalorder %v2476_v27, 0 }
 0x3f6   :  { %1932 = vmatpush3.xpose.msk.msra.mxu0 %vm90_vm1, %v2437_v1  ;;  %v1320_v19 = vmul.f32 1.442695, %v1318_v15  ;;  %vm1190_vm5 = vcmp.eq.s32.totalorder %v1186_v21, %v2476_v27  ;;  %vm1685_vm9 = vcmp.eq.s32.totalorder %v2476_v27, 2  ;;  %vm1693_vm10 = vcmp.eq.s32.totalorder %v2476_v27, 3 }
 0x3f8   :  { %1978 = vpow2.f32 %v1320_v19 }
 0x3f9   :  { %1934 = vmatmul.mubr.msk.f32.vlgmr.msra.gmra.mxu0 %vm90_vm1, %v2424_v62 }
 0x400   :  { %v1973_v29 = vpop.eup %1972 }
 0x401   :  { %v1975_v32 = vpop.eup %1974  ;;  %v1196_v35 = vsel %vm1190_vm5, 0.0, %v1973_v29  ;;  %v1613_v29 = vmul.f32 %v2404_v57, %v2346_v59 }
 0x402   :  { %v1977_v36 = vpop.eup %1976  ;;  %v1195_v40 = vsel %vm1189_vm6, 0.0, %v1975_v32  ;;  %v1200_v42 = vsel %vm90_vm1, %v1196_v35, 0.0  ;;  %v1630_v32 = vmul.f32 %v2424_v62, %v2342_v58 }
 0x403   :  { %v1325_v43 = vsel %vm1190_vm5, 0.0, %v1977_v36  ;;  %v1197_v44 = vsel %vm90_vm1, %v1195_v40, 0.0 }
 0x404   :  { %v1329_v46 = vsel %vm90_vm1, %v1325_v43, 0.0 }
 0x405   :  { %v1979_v41 = vpop.eup %1978 }
 0x406   :  { %v1324_v45 = vsel %vm1189_vm6, 0.0, %v1979_v41 }
 0x407   :  { %v1326_v47 = vsel %vm90_vm1, %v1324_v45, 0.0 }
 0x4b1   :  { %v1928_v20 = vpop.f32.mrf.mxu1 }
 0x4b2   :  { %v1439_v23 = vmul.f32 14.285714, %v1928_v20 }
 0x4b3   :  { %v1429_v6 = vpop.f32.mrf.mxu1 }
 0x4b4   :  { %v1438_v24 = vmul.f32 14.285714, %v1429_v6  ;;  %v1443_v25 = vsel %vm90_vm1, %v1439_v23, -inf }
 0x4b5   :  { %1444 = vmax.xlane.f32.xlu1 %v1443_v25  ;;  %v1203_v25 = vmul.f32 %v2306_v14, %v2311_v16 }
 0x4b6   :  { %v1440_v22 = vsel %vm90_vm1, %v1438_v24, -inf }
 0x4b7   :  { %1441 = vmax.xlane.f32.xlu0 %v1440_v22  ;;  %v1204_v21 = vsel %vm90_vm1, %v1203_v25, 0.0 }
 0x4b9   :  { %v1935_v28 = vpop.f32.mrf.mxu0 }
 0x4ba   :  { %v1566_v30 = vmul.f32 14.285714, %v1935_v28  ;;  %v1588_v28 = vsel %vm90_vm1, %v2445_v2, 0.0  ;;  %v1629_v2 = vmul.f32 %v2437_v1, %v2306_v14 }
 0x4bb   :  { %v1556_v31 = vpop.f32.mrf.mxu0 }
 0x4bc   :  { %v1565_v33 = vmul.f32 14.285714, %v1556_v31  ;;  %v1570_v34 = vsel %vm90_vm1, %v1566_v30, -inf  ;;  %v1617_v31 = vsel %vm90_vm1, %v1613_v29, 0.0  ;;  %v1631_v57 = vsel %vm90_vm1, %v1629_v2, 0.0 }
 0x4bd   :  { %1571 = vmax.xlane.f32.xlu1 %v1570_v34 }
 0x4be   :  { %v1567_v39 = vsel %vm90_vm1, %v1565_v33, -inf }
 0x4bf   :  { %1568 = vmax.xlane.f32.xlu0 %v1567_v39 }
 0x4c1   :  { %1201 = vadd.xlane.f32.xlu1 %v1200_v42 }
 0x4c3   :  { %1198 = vadd.xlane.f32.xlu0 %v1197_v44 }
 0x4c5   :  { %1330 = vadd.xlane.f32.xlu1 %v1329_v46 }
 0x4c7   :  { %1327 = vadd.xlane.f32.xlu0 %v1326_v47 }
 0x53e   :  { %v2497_v48 = vpop.xlane.xlu1 %1444 }
 0x53f   :  { %v1447_v49 = vsub.f32 %v1439_v23, %v2497_v48  ;;  %v1332_v23 = vmul.f32 %v2342_v58, %v2346_v59  ;;  %v1634_v59 = vsel %vm90_vm1, %v1630_v32, 0.0  ;;  %v1649_v58 = vsel %vm90_vm1, %v2449_v3, 0.0 }
 0x540   :  { %v2500_v50 = vpop.xlane.xlu0 %1441 }
 0x541   :  { %v1450_v51 = vmul.f32 1.442695, %v1447_v49  ;;  %v1446_v52 = vsub.f32 %v1438_v24, %v2500_v50  ;;  %v1333_v22 = vsel %vm90_vm1, %v1332_v23, 0.0 }
 0x543   :  { %1980 = vpow2.f32 %v1450_v51  ;;  %v1448_v53 = vmul.f32 1.442695, %v1446_v52 }
 0x545   :  { %1982 = vpow2.f32 %v1448_v53 }
 0x546   :  { %v2503_v54 = vpop.xlane.xlu1 %1571 }
 0x547   :  { %v1574_v55 = vsub.f32 %v1566_v30, %v2503_v54  ;;  %v1612_v30 = vmul.f32 %v2411_v38, %v2311_v16  ;;  %v1652_v16 = vsel %vm90_vm1, %v2432_v63, 0.0  ;;  %v2026_v38 = vmov 0  }
 0x548   :  { %v2506_v56 = vpop.xlane.xlu0 %1568  ;;  %1939 = vset.pattern.permute.xlu1 %v2026_v38  ;;  %1938 = vset.pattern.permute.xlu0 %v2026_v38 }
 0x549   :  { %v1577_v37 = vmul.f32 1.442695, %v1574_v55  ;;  %v1573_v61 = vsub.f32 %v1565_v33, %v2506_v56  ;;  %v1614_v33 = vsel %vm90_vm1, %v1612_v30, 0.0 }
 0x54a   :  { %v1202_v60 = vpop.xlane.xlu1 %1201 }
 0x54b   :  { %1984 = vpow2.f32 %v1577_v37  ;;  %v1575_v0 = vmul.f32 1.442695, %v1573_v61 }
 0x54c   :  { %v1199_v14 = vpop.xlane.xlu0 %1198 }
 0x54d   :  { %1986 = vpow2.f32 %v1575_v0 }
 0x54e   :  { %v1331_v62 = vpop.xlane.xlu1 %1330 }
 0x54f   :  { %1988 = vlog2.f32 %v1331_v62 }
 0x550   :  { %v1981_v7 = vpop.eup %1980  ;;  %v1328_v1 = vpop.xlane.xlu0 %1327 }
 0x551   :  { %v1453_v9 = vsel %vm1190_vm5, 0.0, %v1981_v7  ;;  %1990 = vlog2.f32 %v1328_v1 }
 0x552   :  { %v1983_v11 = vpop.eup %1982  ;;  %v1457_v12 = vsel %vm90_vm1, %v1453_v9, 0.0  ;;  %1992 = vlog2.f32 %v1199_v14 }
 0x553   :  { %1458 = vadd.xlane.f32.xlu1 %v1457_v12  ;;  %v1452_v13 = vsel %vm1189_vm6, 0.0, %v1983_v11  ;;  %1994 = vlog2.f32 %v1202_v60 }
 0x554   :  { %v1454_v15 = vsel %vm90_vm1, %v1452_v13, 0.0 }
 0x555   :  { %1455 = vadd.xlane.f32.xlu0 %v1454_v15 }
 0x558   :  { %v1985_v17 = vpop.eup %1984 }
 0x559   :  { %v1580_v19 = vsel %vm1190_vm5, 0.0, %v1985_v17 }
 0x55a   :  { %v1987_v18 = vpop.eup %1986  ;;  %v1584_v20 = vsel %vm90_vm1, %v1580_v19, 0.0 }
 0x55b   :  { %1585 = vadd.xlane.f32.xlu1 %v1584_v20  ;;  %v1579_v6 = vsel %vm1189_vm6, 0.0, %v1987_v18 }
 0x55c   :  { %v1581_v24 = vsel %vm90_vm1, %v1579_v6, 0.0  ;;  %v1989_v3 = vpop.eup %1988  ;;  %vm1216_vm1 = vcmask 7168  }
 0x55d   :  { %1582 = vadd.xlane.f32.xlu0 %v1581_v24  ;;  %v1342_v43 = vmul.f32 0.6931472, %v1989_v3 }
 0x55e   :  { %v1991_v39 = vpop.eup %1990 }
 0x55f   :  { %1334 = vadd.xlane.f32.xlu1 %v1333_v22  ;;  %v1993_v42 = vpop.eup %1992  ;;  %v1340_v46 = vmul.f32 0.6931472, %v1991_v39 }
 0x560   :  { %v1995_v45 = vpop.eup %1994  ;;  %v1211_v55 = vmul.f32 0.6931472, %v1993_v42 }
 0x561   :  { %1205 = vadd.xlane.f32.xlu0 %v1204_v21  ;;  %v1213_v9 = vmul.f32 0.6931472, %v1995_v45 }
 0x563   :  { %1589 = vadd.xlane.f32.xlu1 %v1588_v28 }
 0x565   :  { %1462 = vadd.xlane.f32.xlu0 %v1461_v26 }
 0x567   :  { %1618 = vadd.xlane.f32.xlu1 %v1617_v31 }
 0x569   :  { %1615 = vadd.xlane.f32.xlu0 %v1614_v33 }
 0x56b   :  { %1635 = vadd.xlane.f32.xlu1 %v1634_v59 }
 0x56d   :  { %1632 = vadd.xlane.f32.xlu0 %v1631_v57 }
 0x56f   :  { %1653 = vadd.xlane.f32.xlu1 %v1652_v16 }
 0x571   :  { %1650 = vadd.xlane.f32.xlu0 %v1649_v58 }
 0x5dc   :  { %v1459_v34 = vpop.xlane.xlu1 %1458 }
 0x5dd   :  { %1996 = vlog2.f32 %v1459_v34 }
 0x5de   :  { %v1456_v35 = vpop.xlane.xlu0 %1455 }
 0x5df   :  { %1998 = vlog2.f32 %v1456_v35 }
 0x5e4   :  { %v1586_v63 = vpop.xlane.xlu1 %1585 }
 0x5e5   :  { %2000 = vlog2.f32 %v1586_v63 }
 0x5e6   :  { %v1583_v36 = vpop.xlane.xlu0 %1582 }
 0x5e7   :  { %2002 = vlog2.f32 %v1583_v36 }
 0x5e8   :  { %v1335_v40 = vpop.xlane.xlu1 %1334 }
 0x5e9   :  { %v1336_v41 = vmul.f32 14.285714, %v1335_v40 }
 0x5ea   :  { %v1206_v44 = vpop.xlane.xlu0 %1205  ;;  %v1997_v53 = vpop.eup %1996 }
 0x5eb   :  { %v1337_v47 = vsub.f32 %v1336_v41, %v2465_v10  ;;  %v1338_v49 = vsub.f32 %v1336_v41, %v2461_v8  ;;  %v1207_v51 = vmul.f32 14.285714, %v1206_v44  ;;  %v1470_v19 = vmul.f32 0.6931472, %v1997_v53 }
 0x5ec   :  { %v1590_v52 = vpop.xlane.xlu1 %1589  ;;  %v1999_v7 = vpop.eup %1998 }
 0x5ed   :  { %v1343_v37 = vsub.f32 %v1337_v47, %v1340_v46  ;;  %v1344_v61 = vsub.f32 %v1338_v49, %v1342_v43  ;;  %v1208_v0 = vsub.f32 %v1207_v51, %v2457_v5  ;;  %v1209_v11 = vsub.f32 %v1207_v51, %v2455_v4 }
 0x5ee   :  { %v1591_v12 = vmul.f32 14.285714, %v1590_v52  ;;  %v1463_v13 = vpop.xlane.xlu0 %1462  ;;  %v1468_v6 = vmul.f32 0.6931472, %v1999_v7 }
 0x5ef   :  { %v1345_v15 = vsel %vm1216_vm1, %v1343_v37, 0.0  ;;  %v1346_v10 = vsel %vm1216_vm1, %v1344_v61, 0.0  ;;  %v1214_v8 = vsub.f32 %v1208_v0, %v1211_v55  ;;  %v1464_v17 = vmul.f32 14.285714, %v1463_v13 }
 0x5f0   :  { %v1347_v18 = vadd.f32 %v1346_v10, %v1345_v15  ;;  %v1215_v20 = vsub.f32 %v1209_v11, %v1213_v9  ;;  %v1619_v23 = vpop.xlane.xlu1 %1618  ;;  %v1593_v28 = vsub.f32 %v1591_v12, %v2503_v54  ;;  %v1592_v59 = vsub.f32 %v1591_v12, %v2506_v56 }
 0x5f1   :  { %v1217_v24 = vsel %vm1216_vm1, %v1214_v8, 0.0  ;;  %v1465_v5 = vsub.f32 %v1464_v17, %v2500_v50  ;;  %v1466_v25 = vsub.f32 %v1464_v17, %v2497_v48  ;;  %v1621_v57 = vand.u32 2147483647, %v1619_v23 }
 0x5f2   :  { %v2001_v4 = vpop.eup %2000  ;;  %v1348_v22 = vrot.slane %v1347_v18, 4  ;;  %v1218_v21 = vsel %vm1216_vm1, %v1215_v20, 0.0  ;;  %v1616_v29 = vpop.xlane.xlu0 %1615 }
 0x5f3   :  { %v1597_v26 = vmul.f32 0.6931472, %v2001_v4  ;;  %v1219_v30 = vadd.f32 %v1218_v21, %v1217_v24  ;;  %v1471_v31 = vsub.f32 %v1465_v5, %v1468_v6  ;;  %v1472_v32 = vsub.f32 %v1466_v25, %v1470_v19 }
 0x5f4   :  { %v2003_v33 = vpop.eup %2002  ;;  %v1349_v2 = vadd.f32 %v1348_v22, %v1347_v18  ;;  %v1620_v16 = vand.u32 2147483647, %v1616_v29  ;;  %v1636_v50 = vpop.xlane.xlu1 %1635 }
 0x5f5   :  { %v1595_v58 = vmul.f32 0.6931472, %v2003_v33  ;;  %v1220_v48 = vrot.slane %v1219_v30, 4  ;;  %v1599_v38 = vsub.f32 %v1593_v28, %v1597_v26  ;;  %v1473_v60 = vsel %vm1216_vm1, %v1471_v31, 0.0 }
 0x5f6   :  { %v1474_v14 = vsel %vm1216_vm1, %v1472_v32, 0.0  ;;  %v1622_v54 = vadd.f32 %v1621_v57, %v1620_v16  ;;  %v1633_v62 = vpop.xlane.xlu0 %1632  ;;  %v1350_v1 = vrot.slane %v1349_v2, 2  ;;  %v1638_v3 = vand.u32 2147483647, %v1636_v50 }
 0x5f7   :  { %v1221_v34 = vadd.f32 %v1220_v48, %v1219_v30  ;;  %v1598_v35 = vsub.f32 %v1592_v59, %v1595_v58  ;;  %v1475_v63 = vadd.f32 %v1474_v14, %v1473_v60  ;;  %v1637_v39 = vand.u32 2147483647, %v1633_v62 }
 0x5f8   :  { %v1623_v36 = vrot.slane %v1622_v54, 4  ;;  %v1654_v56 = vpop.xlane.xlu1 %1653  ;;  %v1351_v40 = vadd.f32 %v1350_v1, %v1349_v2  ;;  %v1601_v42 = vsel %vm1216_vm1, %v1599_v38, 0.0 }
 0x5f9   :  { %v1600_v41 = vsel %vm1216_vm1, %v1598_v35, 0.0  ;;  %v1476_v43 = vrot.slane %v1475_v63, 4  ;;  %v1222_v44 = vrot.slane %v1221_v34, 2  ;;  %v1639_v47 = vadd.f32 %v1638_v3, %v1637_v39 }
 0x5fa   :  { %v1602_v45 = vadd.f32 %v1601_v42, %v1600_v41  ;;  %v1624_v46 = vadd.f32 %v1623_v36, %v1622_v54  ;;  %v1651_v49 = vpop.xlane.xlu0 %1650  ;;  %v1352_v51 = vrot.slane %v1351_v40, 1  ;;  %v1656_v53 = vand.u32 2147483647, %v1654_v56 }
 0x5fb   :  { %v1477_v52 = vadd.f32 %v1476_v43, %v1475_v63  ;;  %v1655_v55 = vand.u32 2147483647, %v1651_v49  ;;  %v1223_v37 = vadd.f32 %v1222_v44, %v1221_v34  ;;  %v1640_v7 = vrot.slane %v1639_v47, 4 }
 0x5fc   :  { %v1603_v61 = vrot.slane %v1602_v45, 4  ;;  %v1625_v0 = vrot.slane %v1624_v46, 2  ;;  %v1353_v9 = vadd.f32 %v1352_v51, %v1351_v40 }
 0x5fd   :  { %v1657_v11 = vadd.f32 %v1656_v53, %v1655_v55  ;;  %v1224_v12 = vrot.slane %v1223_v37, 1  ;;  %v1478_v13 = vrot.slane %v1477_v52, 2  ;;  %v1641_v8 = vadd.f32 %v1640_v7, %v1639_v47 }
 0x5fe   :  { %v1604_v15 = vadd.f32 %v1603_v61, %v1602_v45  ;;  %v1626_v10 = vadd.f32 %v1625_v0, %v1624_v46  ;;  %v1354_v18 = vmul.f32 -1.0, %v1353_v9 }
 0x5ff   :  { %v1658_v17 = vrot.slane %v1657_v11, 4  ;;  %v1225_v19 = vadd.f32 %v1224_v12, %v1223_v37  ;;  %v1479_v20 = vadd.f32 %v1478_v13, %v1477_v52  ;;  %v1642_v23 = vrot.slane %v1641_v8, 2 }
 0x600   :  { %v1605_v6 = vrot.slane %v1604_v15, 2  ;;  %v1627_v4 = vrot.slane %v1626_v10, 1  ;;  %v1355_v26 = vmul.f32 0.0625, %v1354_v18 }
 0x601   :  { %v1659_v24 = vadd.f32 %v1658_v17, %v1657_v11  ;;  %v1226_v5 = vmul.f32 -1.0, %v1225_v19  ;;  %v1480_v25 = vrot.slane %v1479_v20, 1  ;;  %v1643_v22 = vadd.f32 %v1642_v23, %v1641_v8 }
 0x602   :  { %v1606_v21 = vadd.f32 %v1605_v6, %v1604_v15  ;;  %v1628_v50 = vadd.f32 %v1627_v4, %v1626_v10 }
 0x603   :  { %v1660_v28 = vrot.slane %v1659_v24, 2  ;;  %v1228_v29 = vmul.f32 0.0625, %v1226_v5  ;;  %v1481_v30 = vadd.f32 %v1480_v25, %v1479_v20  ;;  %v1644_v31 = vrot.slane %v1643_v22, 1 }
 0x604   :  { %v1607_v32 = vrot.slane %v1606_v21, 1 }
 0x605   :  { %v1661_v33 = vadd.f32 %v1660_v28, %v1659_v24  ;;  %v1356_v2 = vadd.f32 %v1355_v26, %v1228_v29  ;;  %v1645_v59 = vadd.f32 %v1644_v31, %v1643_v22  ;;  %v1482_v57 = vmul.f32 -1.0, %v1481_v30 }
 0x606   :  { %v1608_v16 = vadd.f32 %v1607_v32, %v1606_v21 }
 0x607   :  { %v1662_v58 = vrot.slane %v1661_v33, 1  ;;  %1680 = vperm.xlu1 %1939, %v1356_v2   ;;  %v1646_v60 = vadd.f32 %v1645_v59, %v1628_v50  ;;  %v1483_v14 = vmul.f32 0.0625, %v1482_v57 }
 0x608   :  { %v1609_v48 = vmul.f32 -1.0, %v1608_v16 }
 0x609   :  { %v1663_v38 = vadd.f32 %v1662_v58, %v1661_v33 }
 0x60a   :  { %v1610_v54 = vmul.f32 0.0625, %v1609_v48 }
 0x60b   :  { %v1664_v62 = vadd.f32 %v1663_v38, %v1646_v60 }
 0x60c   :  { %v1611_v1 = vadd.f32 %v1610_v54, %v1483_v14 }
 0x60d   :  { %v1666_v34 = vmul.f32 0.125, %v1664_v62 }
 0x60e   :  { %1688 = vperm.xlu1 %1939, %v1611_v1   ;;  %v1667_v35 = vadd.f32 %v1611_v1, %v1356_v2 }
 0x60f   :  { %v1668_v63 = vmul.f32 0.001, %v1666_v34  ;;  %v1694_v45 = vsel %vm1693_vm10, %v1666_v34, 0.0 }
 0x611   :  { %v1669_v36 = vadd.f32 %v1668_v63, %v1667_v35 }
 0x613   :  { %1673 = vperm.xlu0 %1938, %v1669_v36  }
 0x682   :  { %v1681_v3 = vpop.permute.xlu1 %1680 }
 0x683   :  { %v1683_v40 = vsel %vm1677_vm7, %v1681_v3, 0.0 }
 0x689   :  { %v1689_v39 = vpop.permute.xlu1 %1688 }
 0x68a   :  { %v1691_v43 = vsel %vm1685_vm9, %v1689_v39, 0.0 }
 0x68e   :  { %v1674_v56 = vpop.permute.xlu0 %1673 }
 0x68f   :  { %v1676_v41 = vsel %vm1670_vm8, %v1674_v56, 0.0 }
 0x690   :  { %v1684_v42 = vadd.f32 %v1683_v40, %v1676_v41 }
 0x692   :  { %v1692_v44 = vadd.f32 %v1691_v43, %v1684_v42 }
 0x694   :  { %v1695_v46 = vadd.f32 %v1694_v45, %v1692_v44 }
 0x696   :  { %1697 = vst.msk [vmem:[#allocation2] sm:$0x1] %vm1696_vm11, %v1695_v46 }
 0x697   :  { %2015 = shalt.err (!%p2012_p4)
}
 0x698   :  { %1707 = dma.vmem_to_hbm [thread:$0]  %s1705_s21, 16, %s2594_s22, [#allocation3]  }
 0x699   :  { %2024 = dma.done.wait [#allocation3], 16  }
 0x69a   :  { %2025 = vsyncadd [#allocation3], 4294967280 }
 0x69b   :  { %1711 = vsyncpa [#allocation3], 1 }

</bundles_post_ra>
